<compile_context>
chip_gen: v6e
topology: v6e:2x2x1
jax: 0.10.0
libtpu: 0.0.40
codegen_flags: <defaults>
</compile_context>

<pallas_src>
import functools

import jax
import jax.numpy as jnp
from jax import lax
from jax.experimental import pallas as pl
from jax.experimental.pallas import tpu as pltpu

LN_EPS = 1e-5
BN_EPS = 1e-5


def _round_up(x, m):
    return (x + m - 1) // m * m


def _conv_module_kernel(pad_l, t_orig, d_real, n_acc,
                        x_hbm, ln_g_ref, ln_b_ref,
                        w1v_ref, b1v_ref, w1g_ref, b1g_ref,
                        dw_w_ref, wdp_ref, bmid_ref,
                        w2_ref, b2_ref,
                        o_ref,
                        x_win, g_win, copy_sem):
    b = pl.program_id(0)
    t = pl.program_id(1)
    nt = pl.num_programs(1)
    t_tile, d = o_ref.shape[1], o_ref.shape[2]
    t_w = x_win.shape[1]                      # = t_tile + K - 1
    k_taps = dw_w_ref.shape[0]
    mm_dtype = w1v_ref.dtype                  # matmul operand dtype (bf16 or f32)
    slot = t % 2

    # --- double-buffered halo DMA: prime at t==0, prefetch t+1, wait current -
    def start_fetch(t_idx, s):
        start = pl.multiple_of(t_idx * t_tile, 8)   # t_tile is a multiple of 8
        pltpu.make_async_copy(x_hbm.at[b, pl.ds(start, t_w), :],
                              x_win.at[s], copy_sem.at[s]).start()

    @pl.when(t == 0)
    def _():
        start_fetch(0, 0)                     # prime this batch row's pipeline

    @pl.when(t + 1 < nt)
    def _():
        start_fetch(t + 1, 1 - slot)          # overlaps with the compute below

    pltpu.make_async_copy(x_hbm.at[b, pl.ds(0, t_w), :],
                          x_win.at[slot], copy_sem.at[slot]).wait()
    xw = x_win[slot].astype(jnp.float32)

    # --- LayerNorm over the real d_model channels (padded lanes are zero) ----
    inv_d = 1.0 / d_real
    mean = jnp.sum(xw, axis=-1, keepdims=True) * inv_d
    ex2 = jnp.sum(xw * xw, axis=-1, keepdims=True) * inv_d
    var = jnp.maximum(ex2 - mean * mean, 0.0)
    xn = (xw - mean) * lax.rsqrt(var + LN_EPS) * ln_g_ref[0] + ln_b_ref[0]

    # --- pointwise_conv1 split into value / gate halves + GLU ----------------
    xn_mm = xn.astype(mm_dtype)
    val = jnp.dot(xn_mm, w1v_ref[...], preferred_element_type=jnp.float32) + b1v_ref[0]
    gate = jnp.dot(xn_mm, w1g_ref[...], preferred_element_type=jnp.float32) + b1g_ref[0]
    g = val * jax.nn.sigmoid(gate)

    # --- zero rows that fall in the 'same' padding / past the sequence end ---
    rows = lax.broadcasted_iota(jnp.int32, (t_w, 1), 0) + t * t_tile
    valid = jnp.logical_and(rows >= pad_l, rows < pad_l + t_orig)
    g_win[...] = jnp.where(valid, g, 0.0)     # aligned, full-buffer store

    # --- depthwise conv along time: K shifted MACs, fanned-out accumulators --
    # TODO(synk): v6e/v7x could pack this loop in bf16 (2 elems/lane) and group
    # taps by sublane phase (aligned load + pltpu.roll); kept f32 for v5e parity
    # and bit-stable correctness.
    part = [jnp.zeros((t_tile, d), jnp.float32) for _ in range(n_acc)]
    for k in range(k_taps):                   # static, unrolled taps
        part[k % n_acc] = part[k % n_acc] + g_win[k:k + t_tile, :] * dw_w_ref[k, :]
    acc = part[0]
    for p in part[1:]:
        acc = acc + p

    # --- 1x1 conv after the depthwise conv (dw bias + BatchNorm folded) ------
    y = jnp.dot(acc.astype(mm_dtype), wdp_ref[...],
                preferred_element_type=jnp.float32) + bmid_ref[0]
    y = jnp.maximum(y, 0.0)                   # ReLU

    # --- pointwise_conv2 ------------------------------------------------------
    y = jnp.dot(y.astype(mm_dtype), w2_ref[...],
                preferred_element_type=jnp.float32) + b2_ref[0]
    # TODO(synk): nn.Dropout omitted (inference semantics: identity).
    o_ref[0] = y.astype(o_ref.dtype)


def convolution_module_forward(x, params, *, t_tile=256,
                               matmul_dtype=jnp.bfloat16, n_acc=4):
    """x: (B, T, D) float32. Returns (B, T, D).

    t_tile: time tile (rounded to a multiple of 8, shrunk to fit the VMEM
    budget of the current TPU generation).  256+ fills the v6e/v7x 2x256x256
    MXU; 128-256 is enough on v5e.
    matmul_dtype: bf16 runs the three 1x1 convs on the MXU at bf16 rate with
    f32 accumulation; LN/GLU/depthwise stay f32 (no bf16 VPU on v5e).
    """
    B, T, D = x.shape
    K = params['dw_w'].shape[-1]
    pad_l = K // 2
    f32 = jnp.float32

    # Lane-dense channel dimension: pad d_model to a multiple of 128.
    Dp = max(128, _round_up(D, 128))

    # Time tile: multiple of 8, no larger than the (rounded) sequence, shrunk
    # to fit the per-generation VMEM budget.
    t_tile = min(_round_up(max(int(t_tile), 8), 8), _round_up(T, 8))
    try:
        vmem_cap = int(pltpu.get_tpu_info().vmem_capacity_bytes)
    except Exception:
        vmem_cap = 64 * 1024 * 1024            # conservative (v7x per-core VMEM)
    vmem_limit = max(32 * 1024 * 1024, min((vmem_cap * 3) // 4, 96 * 1024 * 1024))
    mm_bytes = jnp.dtype(matmul_dtype).itemsize
    n_acc_eff = max(1, min(n_acc, K))

    def _vmem_estimate(tt):
        tw = tt + K - 1
        weights = 2 * (4 * Dp * Dp * mm_bytes + (K + 8) * Dp * 4)   # double-buffered consts
        step = (2 * tw * Dp * x.dtype.itemsize        # x window double buffer
                + tw * Dp * 4                          # masked GLU scratch
                + 2 * tt * Dp * x.dtype.itemsize       # output double buffer
                + (n_acc_eff + 2) * tt * Dp * 4)       # accumulators / live temps
        return weights + step

    while t_tile > 8 and _vmem_estimate(t_tile) > int(vmem_limit * 0.8):
        t_tile = max(8, _round_up(t_tile // 2, 8))

    nt = pl.cdiv(T, t_tile)
    t_round = nt * t_tile
    t_w = t_tile + K - 1
    L = t_round + K - 1

    # Zero-padded input (time halo + lane padding).  The HBM copy is required
    # anyway whenever D is not a multiple of 128; the time padding makes every
    # (tile + halo) DMA window a plain in-bounds slice.
    # TODO(synk): when D % 128 == 0 the copy could be avoided by clamping the
    # DMA window in-kernel.
    x_pad = jnp.zeros((B, L, Dp), x.dtype).at[:, pad_l:pad_l + T, :D].set(x)

    def lane_pad_vec(v):                       # (D,) -> (1, Dp)
        return jnp.zeros((1, Dp), f32).at[0, :D].set(v.astype(f32))

    def lane_pad_mat(m):                       # (D, D) -> (Dp, Dp)
        return jnp.zeros((Dp, Dp), f32).at[:D, :D].set(m.astype(f32))

    ln_g = lane_pad_vec(params['ln_g'])
    ln_b = lane_pad_vec(params['ln_b'])
    pw1_w = params['pw1_w'][:, :, 0].astype(f32)            # (2D, D)
    w1v = lane_pad_mat(pw1_w[:D].T).astype(matmul_dtype)    # value half
    w1g = lane_pad_mat(pw1_w[D:].T).astype(matmul_dtype)    # gate half
    b1v = lane_pad_vec(params['pw1_b'][:D])
    b1g = lane_pad_vec(params['pw1_b'][D:])
    dw_w = jnp.zeros((K, Dp), f32).at[:, :D].set(params['dw_w'][:, 0, :].T.astype(f32))

    # Fold BatchNorm (running stats) and the depthwise-conv bias into the
    # post-depthwise 1x1 conv:  relu((conv + dw_b) @ W * s + (b*s + sh))
    #                         = relu(conv @ (W*s) + (dw_b @ (W*s) + b*s + sh)).
    bn_scale = params['bn_g'].astype(f32) / jnp.sqrt(params['bn_var'].astype(f32) + BN_EPS)
    bn_shift = params['bn_b'].astype(f32) - params['bn_mean'].astype(f32) * bn_scale
    wdp_f = params['dwpw_w'][:, :, 0].T.astype(f32) * bn_scale[None, :]
    bias_mid = (params['dw_b'].astype(f32) @ wdp_f
                + params['dwpw_b'].astype(f32) * bn_scale + bn_shift)
    wdp = lane_pad_mat(wdp_f).astype(matmul_dtype)
    bmid = lane_pad_vec(bias_mid)
    w2 = lane_pad_mat(params['pw2_w'][:, :, 0].T).astype(matmul_dtype)
    b2 = lane_pad_vec(params['pw2_b'])

    def const_spec(shape):
        return pl.BlockSpec(shape, lambda b, t, _s=shape: (0,) * len(_s))

    kernel = functools.partial(_conv_module_kernel, pad_l, T, D, n_acc_eff)

    out = pl.pallas_call(
        kernel,
        out_shape=jax.ShapeDtypeStruct((B, T, Dp), x.dtype),
        grid_spec=pltpu.PrefetchScalarGridSpec(
            num_scalar_prefetch=0,
            grid=(B, nt),
            in_specs=[
                pl.BlockSpec(memory_space=pl.ANY),           # x_pad (HBM, manual halo DMA)
                const_spec((1, Dp)), const_spec((1, Dp)),    # LN gamma, beta
                const_spec((Dp, Dp)), const_spec((1, Dp)),   # pw1 value half
                const_spec((Dp, Dp)), const_spec((1, Dp)),   # pw1 gate half
                const_spec((K, Dp)),                         # depthwise taps
                const_spec((Dp, Dp)), const_spec((1, Dp)),   # depthwise 1x1 (BN+biases folded)
                const_spec((Dp, Dp)), const_spec((1, Dp)),   # pointwise_conv2
            ],
            out_specs=pl.BlockSpec((1, t_tile, Dp), lambda b, t: (b, t, 0)),
            scratch_shapes=[
                pltpu.VMEM((2, t_w, Dp), x.dtype),           # double-buffered x window
                pltpu.VMEM((t_w, Dp), jnp.float32),          # masked GLU output
                pltpu.SemaphoreType.DMA((2,)),
            ],
        ),
        compiler_params=pltpu.CompilerParams(
            dimension_semantics=("parallel", "arbitrary"),   # batch on 2 TCs, time sequential
            vmem_limit_bytes=int(vmem_limit)),
    )(x_pad, ln_g, ln_b, w1v, b1v, w1g, b1g, dw_w, wdp, bmid, w2, b2)

    return out if Dp == D else out[..., :D]


def reference_forward(x, params):
    """Pure-JAX reference matching the PyTorch forward (eval mode)."""
    B, T, D = x.shape
    K = params['dw_w'].shape[-1]
    pad_l = K // 2
    pad_r = pad_l - (K + 1) % 2
    mean = x.mean(-1, keepdims=True)
    var = ((x - mean) ** 2).mean(-1, keepdims=True)
    xn = (x - mean) / jnp.sqrt(var + LN_EPS) * params['ln_g'] + params['ln_b']
    xc = jnp.transpose(xn, (0, 2, 1))                       # (B, D, T)
    h = jnp.einsum('oc,bct->bot', params['pw1_w'][:, :, 0], xc)
    h = h + params['pw1_b'][None, :, None]
    out, gate = h[:, :D], h[:, D:]
    g = out * jax.nn.sigmoid(gate)
    gp = jnp.pad(g, ((0, 0), (0, 0), (pad_l, pad_r)))
    dconv = lax.conv_general_dilated(
        gp, params['dw_w'], window_strides=(1,), padding='VALID',
        feature_group_count=D, dimension_numbers=('NCH', 'OIH', 'NCH'))
    dconv = dconv + params['dw_b'][None, :, None]
    y = jnp.einsum('oc,bct->bot', params['dwpw_w'][:, :, 0], dconv)
    y = y + params['dwpw_b'][None, :, None]
    y = (y - params['bn_mean'][None, :, None]) / jnp.sqrt(
        params['bn_var'][None, :, None] + BN_EPS)
    y = y * params['bn_g'][None, :, None] + params['bn_b'][None, :, None]
    y = jnp.maximum(y, 0.0)
    y = jnp.einsum('oc,bct->bot', params['pw2_w'][:, :, 0], y)
    y = y + params['pw2_b'][None, :, None]
    return jnp.transpose(y, (0, 2, 1))


def _make_params(key, D, K):
    keys = jax.random.split(key, 14)
    return {
        'ln_g':   1.0 + 0.1 * jax.random.normal(keys[0], (D,), jnp.float32),
        'ln_b':   0.1 * jax.random.normal(keys[1], (D,), jnp.float32),
        'pw1_w':  0.2 * jax.random.normal(keys[2], (2 * D, D, 1), jnp.float32),
        'pw1_b':  0.1 * jax.random.normal(keys[3], (2 * D,), jnp.float32),
        'dw_w':   0.2 * jax.random.normal(keys[4], (D, 1, K), jnp.float32),
        'dw_b':   0.1 * jax.random.normal(keys[5], (D,), jnp.float32),
        'dwpw_w': 0.2 * jax.random.normal(keys[6], (D, D, 1), jnp.float32),
        'dwpw_b': 0.1 * jax.random.normal(keys[7], (D,), jnp.float32),
        'bn_g':   1.0 + 0.1 * jax.random.normal(keys[8], (D,), jnp.float32),
        'bn_b':   0.1 * jax.random.normal(keys[9], (D,), jnp.float32),
        'bn_mean': 0.1 * jax.random.normal(keys[10], (D,), jnp.float32),
        'bn_var': jax.random.uniform(keys[11], (D,), jnp.float32, 0.5, 1.5),
        'pw2_w':  0.2 * jax.random.normal(keys[12], (D, D, 1), jnp.float32),
        'pw2_b':  0.1 * jax.random.normal(keys[13], (D,), jnp.float32),
    }


if __name__ == "__main__":
    key = jax.random.PRNGKey(0)
    kp1, kx1, kp2, kx2 = jax.random.split(key, 4)

    # --- main config: odd K = 31, three time tiles of 16 (exercises halo +
    # double-buffered prefetch chain) ------------------------------------------
    B, T, D, K = 2, 48, 32, 31
    params = _make_params(kp1, D, K)
    x = jax.random.normal(kx1, (B, T, D), jnp.float32)
    ref = reference_forward(x, params)

    out_f32 = jax.block_until_ready(
        convolution_module_forward(x, params, t_tile=16, matmul_dtype=jnp.float32))
    assert out_f32.shape == (B, T, D)
    err_f32 = float(jnp.max(jnp.abs(out_f32 - ref)))
    assert jnp.allclose(out_f32, ref, rtol=2e-4, atol=2e-4), err_f32

    # single-tile path with the default (budget-clamped) t_tile
    out_big = jax.block_until_ready(
        convolution_module_forward(x, params, matmul_dtype=jnp.float32))
    err_big = float(jnp.max(jnp.abs(out_big - ref)))
    assert jnp.allclose(out_big, ref, rtol=2e-4, atol=2e-4), err_big

    # bf16 MXU path (perf config for v6e/v7x): loose sanity bound only.
    out_bf16 = jax.block_until_ready(
        convolution_module_forward(x, params, t_tile=16, matmul_dtype=jnp.bfloat16))
    err_bf16 = float(jnp.max(jnp.abs(out_bf16 - ref)))
    assert err_bf16 < 0.25, err_bf16

    # --- even kernel size + ragged T: asymmetric same-padding (pad_r=pad_l-1)
    # and a partial final output block (T=20, t_tile=8) ------------------------
    B2, T2, D2, K2 = 2, 20, 16, 8
    params2 = _make_params(kp2, D2, K2)
    x2 = jax.random.normal(kx2, (B2, T2, D2), jnp.float32)
    ref2 = reference_forward(x2, params2)
    out2 = jax.block_until_ready(
        convolution_module_forward(x2, params2, t_tile=8, matmul_dtype=jnp.float32))
    assert out2.shape == (B2, T2, D2)
    err2 = float(jnp.max(jnp.abs(out2 - ref2)))
    assert jnp.allclose(out2, ref2, rtol=2e-4, atol=2e-4), err2

    print("KERNEL_OK")
</pallas_src>

<mosaic_0001>
module attributes {stable_mosaic.version = 11 : i64} {
  func.func @_conv_module_kernel(%arg0: i32, %arg1: i32, %arg2: memref<2x78x128xf32, #tpu.memory_space<any>>, %arg3: memref<1x128xf32, #tpu.memory_space<vmem>>, %arg4: memref<1x128xf32, #tpu.memory_space<vmem>>, %arg5: memref<128x128xf32, #tpu.memory_space<vmem>>, %arg6: memref<1x128xf32, #tpu.memory_space<vmem>>, %arg7: memref<128x128xf32, #tpu.memory_space<vmem>>, %arg8: memref<1x128xf32, #tpu.memory_space<vmem>>, %arg9: memref<31x128xf32, #tpu.memory_space<vmem>>, %arg10: memref<128x128xf32, #tpu.memory_space<vmem>>, %arg11: memref<1x128xf32, #tpu.memory_space<vmem>>, %arg12: memref<128x128xf32, #tpu.memory_space<vmem>>, %arg13: memref<1x128xf32, #tpu.memory_space<vmem>>, %arg14: memref<1x16x128xf32, #tpu.memory_space<vmem>>, %arg15: memref<2x46x128xf32, #tpu.memory_space<vmem>>, %arg16: memref<46x128xf32, #tpu.memory_space<vmem>>, %arg17: memref<2x!tpu.dma_semaphore, #tpu.memory_space<semaphore_mem>>) attributes {dimension_semantics = [#tpu.dimension_semantics<parallel>, #tpu.dimension_semantics<arbitrary>], iteration_bounds = array<i64: 2, 3>, scalar_prefetch = 0 : i64, scratch_operands = 3 : i64, tpu.core_type = #tpu.core_type<tc>, window_params = [{}, {pipeline_mode = #tpu.pipeline_mode<synchronous>, transform_indices = @transform_1, window_bounds = array<i64: 1, 128>}, {pipeline_mode = #tpu.pipeline_mode<synchronous>, transform_indices = @transform_2, window_bounds = array<i64: 1, 128>}, {pipeline_mode = #tpu.pipeline_mode<synchronous>, transform_indices = @transform_3, window_bounds = array<i64: 128, 128>}, {pipeline_mode = #tpu.pipeline_mode<synchronous>, transform_indices = @transform_4, window_bounds = array<i64: 1, 128>}, {pipeline_mode = #tpu.pipeline_mode<synchronous>, transform_indices = @transform_5, window_bounds = array<i64: 128, 128>}, {pipeline_mode = #tpu.pipeline_mode<synchronous>, transform_indices = @transform_6, window_bounds = array<i64: 1, 128>}, {pipeline_mode = #tpu.pipeline_mode<synchronous>, transform_indices = @transform_7, window_bounds = array<i64: 31, 128>}, {pipeline_mode = #tpu.pipeline_mode<synchronous>, transform_indices = @transform_8, window_bounds = array<i64: 128, 128>}, {pipeline_mode = #tpu.pipeline_mode<synchronous>, transform_indices = @transform_9, window_bounds = array<i64: 1, 128>}, {pipeline_mode = #tpu.pipeline_mode<synchronous>, transform_indices = @transform_10, window_bounds = array<i64: 128, 128>}, {pipeline_mode = #tpu.pipeline_mode<synchronous>, transform_indices = @transform_11, window_bounds = array<i64: 1, 128>}, {transform_indices = @transform_12, window_bounds = array<i64: 1, 16, 128>}]} {
    %c2_i32 = arith.constant 2 : i32
    %c0_i32 = arith.constant 0 : i32
    %0 = arith.cmpi eq, %c2_i32, %c0_i32 : i32
    %c1_i32 = arith.constant 1 : i32
    %1 = arith.select %0, %c1_i32, %c2_i32 : i32
    %2 = arith.remsi %arg1, %1 : i32
    %c0_i32_0 = arith.constant 0 : i32
    %3 = arith.cmpi ne, %2, %c0_i32_0 : i32
    %c0_i32_1 = arith.constant 0 : i32
    %4 = arith.cmpi slt, %2, %c0_i32_1 : i32
    %c0_i32_2 = arith.constant 0 : i32
    %5 = arith.cmpi slt, %1, %c0_i32_2 : i32
    %6 = arith.xori %4, %5 : i1
    %7 = arith.andi %6, %3 : i1
    %8 = arith.addi %2, %1 : i32
    %9 = arith.select %7, %8, %2 : i32
    %c0_i32_3 = arith.constant 0 : i32
    %10 = arith.cmpi eq, %arg1, %c0_i32_3 : i32
    %11 = arith.extui %10 : i1 to i32
    %c0_i32_4 = arith.constant 0 : i32
    %12 = arith.cmpi ne, %11, %c0_i32_4 : i32
    scf.if %12 {
      %c0_i32_147 = arith.constant 0 : i32
      %333 = tpu.assume_multiple %c0_i32_147, 8 : i32
      %c0_i32_148 = arith.constant 0 : i32
      %c0_i32_149 = arith.constant 0 : i32
      %c0_i32_150 = arith.constant 0 : i32
      %334 = tpu.memref_slice %arg2[%arg0, %333, %c0_i32_150] : memref<2x78x128xf32, #tpu.memory_space<any>> -> memref<1x46x128xf32, #tpu.memory_space<any>>
      %335 = tpu.memref_squeeze %334 : memref<1x46x128xf32, #tpu.memory_space<any>> -> memref<46x128xf32, #tpu.memory_space<any>>
      %c0_i32_151 = arith.constant 0 : i32
      %c0_i32_152 = arith.constant 0 : i32
      %336 = tpu.memref_slice %arg15[%c0_i32_148, %c0_i32_151, %c0_i32_152] : memref<2x46x128xf32, #tpu.memory_space<vmem>> -> memref<1x46x128xf32, #tpu.memory_space<vmem>>
      %337 = tpu.memref_squeeze %336 : memref<1x46x128xf32, #tpu.memory_space<vmem>> -> memref<46x128xf32, #tpu.memory_space<vmem>>
      %338 = tpu.memref_slice %arg17[%c0_i32_149] : memref<2x!tpu.dma_semaphore, #tpu.memory_space<semaphore_mem>> -> memref<1x!tpu.dma_semaphore, #tpu.memory_space<semaphore_mem>>
      %339 = tpu.memref_squeeze %338 : memref<1x!tpu.dma_semaphore, #tpu.memory_space<semaphore_mem>> -> memref<!tpu.dma_semaphore, #tpu.memory_space<semaphore_mem>>
      tpu.enqueue_dma source(%335 : memref<46x128xf32, #tpu.memory_space<any>>) target(%337 : memref<46x128xf32, #tpu.memory_space<vmem>>) target_semaphore(%339 : memref<!tpu.dma_semaphore, #tpu.memory_space<semaphore_mem>>)
    } else {
    }
    %c1_i32_5 = arith.constant 1 : i32
    %13 = arith.addi %arg1, %c1_i32_5 : i32
    %c3_i32 = arith.constant 3 : i32
    %14 = arith.cmpi slt, %13, %c3_i32 : i32
    %15 = arith.extui %14 : i1 to i32
    %c0_i32_6 = arith.constant 0 : i32
    %16 = arith.cmpi ne, %15, %c0_i32_6 : i32
    scf.if %16 {
      %c1_i32_147 = arith.constant 1 : i32
      %333 = arith.addi %arg1, %c1_i32_147 : i32
      %c1_i32_148 = arith.constant 1 : i32
      %334 = arith.subi %c1_i32_148, %9 : i32
      %c16_i32_149 = arith.constant 16 : i32
      %335 = arith.muli %333, %c16_i32_149 : i32
      %336 = tpu.assume_multiple %335, 8 : i32
      %c0_i32_150 = arith.constant 0 : i32
      %337 = tpu.memref_slice %arg2[%arg0, %336, %c0_i32_150] : memref<2x78x128xf32, #tpu.memory_space<any>> -> memref<1x46x128xf32, #tpu.memory_space<any>>
      %338 = tpu.memref_squeeze %337 : memref<1x46x128xf32, #tpu.memory_space<any>> -> memref<46x128xf32, #tpu.memory_space<any>>
      %c0_i32_151 = arith.constant 0 : i32
      %c0_i32_152 = arith.constant 0 : i32
      %339 = tpu.memref_slice %arg15[%334, %c0_i32_151, %c0_i32_152] : memref<2x46x128xf32, #tpu.memory_space<vmem>> -> memref<1x46x128xf32, #tpu.memory_space<vmem>>
      %340 = tpu.memref_squeeze %339 : memref<1x46x128xf32, #tpu.memory_space<vmem>> -> memref<46x128xf32, #tpu.memory_space<vmem>>
      %341 = tpu.memref_slice %arg17[%334] : memref<2x!tpu.dma_semaphore, #tpu.memory_space<semaphore_mem>> -> memref<1x!tpu.dma_semaphore, #tpu.memory_space<semaphore_mem>>
      %342 = tpu.memref_squeeze %341 : memref<1x!tpu.dma_semaphore, #tpu.memory_space<semaphore_mem>> -> memref<!tpu.dma_semaphore, #tpu.memory_space<semaphore_mem>>
      tpu.enqueue_dma source(%338 : memref<46x128xf32, #tpu.memory_space<any>>) target(%340 : memref<46x128xf32, #tpu.memory_space<vmem>>) target_semaphore(%342 : memref<!tpu.dma_semaphore, #tpu.memory_space<semaphore_mem>>)
    } else {
    }
    %c0_i32_7 = arith.constant 0 : i32
    %c0_i32_8 = arith.constant 0 : i32
    %17 = tpu.memref_slice %arg2[%arg0, %c0_i32_7, %c0_i32_8] : memref<2x78x128xf32, #tpu.memory_space<any>> -> memref<1x46x128xf32, #tpu.memory_space<any>>
    %18 = tpu.memref_squeeze %17 : memref<1x46x128xf32, #tpu.memory_space<any>> -> memref<46x128xf32, #tpu.memory_space<any>>
    %c0_i32_9 = arith.constant 0 : i32
    %c0_i32_10 = arith.constant 0 : i32
    %19 = tpu.memref_slice %arg15[%9, %c0_i32_9, %c0_i32_10] : memref<2x46x128xf32, #tpu.memory_space<vmem>> -> memref<1x46x128xf32, #tpu.memory_space<vmem>>
    %20 = tpu.memref_squeeze %19 : memref<1x46x128xf32, #tpu.memory_space<vmem>> -> memref<46x128xf32, #tpu.memory_space<vmem>>
    %21 = tpu.memref_slice %arg17[%9] : memref<2x!tpu.dma_semaphore, #tpu.memory_space<semaphore_mem>> -> memref<1x!tpu.dma_semaphore, #tpu.memory_space<semaphore_mem>>
    %22 = tpu.memref_squeeze %21 : memref<1x!tpu.dma_semaphore, #tpu.memory_space<semaphore_mem>> -> memref<!tpu.dma_semaphore, #tpu.memory_space<semaphore_mem>>
    tpu.wait_dma2 semaphore(%22 : memref<!tpu.dma_semaphore, #tpu.memory_space<semaphore_mem>>) src(%18 : memref<46x128xf32, #tpu.memory_space<any>>) dst(%20 : memref<46x128xf32, #tpu.memory_space<vmem>>)
    %23 = arith.index_cast %9 : i32 to index
    %c0 = arith.constant 0 : index
    %c0_11 = arith.constant 0 : index
    %24 = vector.load %arg15[%23, %c0, %c0_11] : memref<2x46x128xf32, #tpu.memory_space<vmem>>, vector<1x46x128xf32>
    %25 = vector.shape_cast %24 : vector<1x46x128xf32> to vector<46x128xf32>
    %cst = arith.constant dense<0.000000e+00> : vector<46xf32>
    %26 = vector.multi_reduction <add>, %25, %cst [1] : vector<46x128xf32> to vector<46xf32>
    %27 = vector.shape_cast %26 : vector<46xf32> to vector<46x1xf32>
    %cst_12 = arith.constant 3.125000e-02 : f32
    %28 = vector.broadcast %cst_12 : f32 to vector<46x1xf32>
    %29 = arith.mulf %27, %28 : vector<46x1xf32>
    %30 = arith.mulf %25, %25 : vector<46x128xf32>
    %cst_13 = arith.constant dense<0.000000e+00> : vector<46xf32>
    %31 = vector.multi_reduction <add>, %30, %cst_13 [1] : vector<46x128xf32> to vector<46xf32>
    %32 = vector.shape_cast %31 : vector<46xf32> to vector<46x1xf32>
    %cst_14 = arith.constant 3.125000e-02 : f32
    %33 = vector.broadcast %cst_14 : f32 to vector<46x1xf32>
    %34 = arith.mulf %32, %33 : vector<46x1xf32>
    %35 = arith.mulf %29, %29 : vector<46x1xf32>
    %36 = arith.subf %34, %35 : vector<46x1xf32>
    %cst_15 = arith.constant 0.000000e+00 : f32
    %37 = vector.broadcast %cst_15 : f32 to vector<46x1xf32>
    %38 = arith.maximumf %36, %37 : vector<46x1xf32>
    %39 = vector.broadcast %29 : vector<46x1xf32> to vector<46x128xf32>
    %40 = arith.subf %25, %39 : vector<46x128xf32>
    %cst_16 = arith.constant 9.99999974E-6 : f32
    %41 = vector.broadcast %cst_16 : f32 to vector<46x1xf32>
    %42 = arith.addf %38, %41 : vector<46x1xf32>
    %43 = math.rsqrt %42 : vector<46x1xf32>
    %44 = vector.broadcast %43 : vector<46x1xf32> to vector<46x128xf32>
    %45 = arith.mulf %40, %44 : vector<46x128xf32>
    %c0_17 = arith.constant 0 : index
    %c0_18 = arith.constant 0 : index
    %46 = vector.load %arg3[%c0_17, %c0_18] : memref<1x128xf32, #tpu.memory_space<vmem>>, vector<1x128xf32>
    %47 = vector.shape_cast %46 : vector<1x128xf32> to vector<128xf32>
    %48 = vector.shape_cast %47 : vector<128xf32> to vector<1x128xf32>
    %49 = vector.broadcast %48 : vector<1x128xf32> to vector<46x128xf32>
    %50 = arith.mulf %45, %49 : vector<46x128xf32>
    %c0_19 = arith.constant 0 : index
    %c0_20 = arith.constant 0 : index
    %51 = vector.load %arg4[%c0_19, %c0_20] : memref<1x128xf32, #tpu.memory_space<vmem>>, vector<1x128xf32>
    %52 = vector.shape_cast %51 : vector<1x128xf32> to vector<128xf32>
    %53 = vector.shape_cast %52 : vector<128xf32> to vector<1x128xf32>
    %54 = vector.broadcast %53 : vector<1x128xf32> to vector<46x128xf32>
    %55 = arith.addf %50, %54 : vector<46x128xf32>
    %c0_21 = arith.constant 0 : index
    %c0_22 = arith.constant 0 : index
    %56 = vector.load %arg5[%c0_21, %c0_22] : memref<128x128xf32, #tpu.memory_space<vmem>>, vector<128x128xf32>
    %cst_23 = arith.constant dense<0.000000e+00> : vector<46x128xf32>
    %57 = tpu.matmul %55, %56, %cst_23 {dimension_numbers = #tpu.dot_dimension_numbers<[1], [0], [0], [1], [0, 0, 1, 1], [], []>} : vector<46x128xf32>, vector<128x128xf32>, vector<46x128xf32> -> vector<46x128xf32>
    %c0_24 = arith.constant 0 : index
    %c0_25 = arith.constant 0 : index
    %58 = vector.load %arg6[%c0_24, %c0_25] : memref<1x128xf32, #tpu.memory_space<vmem>>, vector<1x128xf32>
    %59 = vector.shape_cast %58 : vector<1x128xf32> to vector<128xf32>
    %60 = vector.shape_cast %59 : vector<128xf32> to vector<1x128xf32>
    %61 = vector.broadcast %60 : vector<1x128xf32> to vector<46x128xf32>
    %62 = arith.addf %57, %61 : vector<46x128xf32>
    %c0_26 = arith.constant 0 : index
    %c0_27 = arith.constant 0 : index
    %63 = vector.load %arg7[%c0_26, %c0_27] : memref<128x128xf32, #tpu.memory_space<vmem>>, vector<128x128xf32>
    %cst_28 = arith.constant dense<0.000000e+00> : vector<46x128xf32>
    %64 = tpu.matmul %55, %63, %cst_28 {dimension_numbers = #tpu.dot_dimension_numbers<[1], [0], [0], [1], [0, 0, 1, 1], [], []>} : vector<46x128xf32>, vector<128x128xf32>, vector<46x128xf32> -> vector<46x128xf32>
    %c0_29 = arith.constant 0 : index
    %c0_30 = arith.constant 0 : index
    %65 = vector.load %arg8[%c0_29, %c0_30] : memref<1x128xf32, #tpu.memory_space<vmem>>, vector<1x128xf32>
    %66 = vector.shape_cast %65 : vector<1x128xf32> to vector<128xf32>
    %67 = vector.shape_cast %66 : vector<128xf32> to vector<1x128xf32>
    %68 = vector.broadcast %67 : vector<1x128xf32> to vector<46x128xf32>
    %69 = arith.addf %64, %68 : vector<46x128xf32>
    %70 = arith.negf %69 : vector<46x128xf32>
    %71 = math.exp %70 : vector<46x128xf32>
    %cst_31 = arith.constant 1.000000e+00 : f32
    %72 = vector.broadcast %cst_31 : f32 to vector<46x128xf32>
    %73 = arith.addf %72, %71 : vector<46x128xf32>
    %74 = arith.divf %72, %73 : vector<46x128xf32>
    %75 = arith.mulf %62, %74 : vector<46x128xf32>
    %76 = tpu.iota {dimensions = array<i32: 0>} : vector<46x1xi32>
    %c16_i32 = arith.constant 16 : i32
    %77 = arith.muli %arg1, %c16_i32 : i32
    %78 = vector.broadcast %77 : i32 to vector<46x1xi32>
    %79 = arith.addi %76, %78 : vector<46x1xi32>
    %c15_i32 = arith.constant 15 : i32
    %80 = vector.broadcast %c15_i32 : i32 to vector<46x1xi32>
    %81 = arith.cmpi sge, %79, %80 : vector<46x1xi32>
    %c63_i32 = arith.constant 63 : i32
    %82 = vector.broadcast %c63_i32 : i32 to vector<46x1xi32>
    %83 = arith.cmpi slt, %79, %82 : vector<46x1xi32>
    %84 = arith.andi %81, %83 : vector<46x1xi1>
    %cst_32 = arith.constant 0.000000e+00 : f32
    %85 = vector.shape_cast %84 : vector<46x1xi1> to vector<46x1xi1>
    %86 = vector.broadcast %85 : vector<46x1xi1> to vector<46x128xi1>
    %87 = vector.broadcast %cst_32 : f32 to vector<46x128xf32>
    %88 = arith.select %86, %75, %87 : vector<46x128xi1>, vector<46x128xf32>
    %c0_33 = arith.constant 0 : index
    %c0_34 = arith.constant 0 : index
    %89 = vector.load %arg16[%c0_33, %c0_34] : memref<46x128xf32, #tpu.memory_space<vmem>>, vector<46x128xf32>
    tpu.vector_store %arg16[%c0_33, %c0_34], %88 {strides = array<i32>} : memref<46x128xf32, #tpu.memory_space<vmem>>, vector<46x128xf32>,
    %cst_35 = arith.constant 0.000000e+00 : f32
    %90 = vector.broadcast %cst_35 : f32 to vector<16x128xf32>
    %cst_36 = arith.constant 0.000000e+00 : f32
    %91 = vector.broadcast %cst_36 : f32 to vector<16x128xf32>
    %cst_37 = arith.constant 0.000000e+00 : f32
    %92 = vector.broadcast %cst_37 : f32 to vector<16x128xf32>
    %cst_38 = arith.constant 0.000000e+00 : f32
    %93 = vector.broadcast %cst_38 : f32 to vector<16x128xf32>
    %c0_39 = arith.constant 0 : index
    %c0_40 = arith.constant 0 : index
    %94 = vector.load %arg16[%c0_39, %c0_40] : memref<46x128xf32, #tpu.memory_space<vmem>>, vector<16x128xf32>
    %c0_41 = arith.constant 0 : index
    %c0_42 = arith.constant 0 : index
    %95 = vector.load %arg9[%c0_41, %c0_42] : memref<31x128xf32, #tpu.memory_space<vmem>>, vector<1x128xf32>
    %96 = vector.shape_cast %95 : vector<1x128xf32> to vector<128xf32>
    %97 = vector.shape_cast %96 : vector<128xf32> to vector<1x128xf32>
    %98 = vector.broadcast %97 : vector<1x128xf32> to vector<16x128xf32>
    %99 = arith.mulf %94, %98 : vector<16x128xf32>
    %100 = arith.addf %90, %99 : vector<16x128xf32>
    %c1 = arith.constant 1 : index
    %c0_43 = arith.constant 0 : index
    %101 = vector.load %arg16[%c1, %c0_43] : memref<46x128xf32, #tpu.memory_space<vmem>>, vector<16x128xf32>
    %c1_44 = arith.constant 1 : index
    %c0_45 = arith.constant 0 : index
    %102 = vector.load %arg9[%c1_44, %c0_45] : memref<31x128xf32, #tpu.memory_space<vmem>>, vector<1x128xf32>
    %103 = vector.shape_cast %102 : vector<1x128xf32> to vector<128xf32>
    %104 = vector.shape_cast %103 : vector<128xf32> to vector<1x128xf32>
    %105 = vector.broadcast %104 : vector<1x128xf32> to vector<16x128xf32>
    %106 = arith.mulf %101, %105 : vector<16x128xf32>
    %107 = arith.addf %91, %106 : vector<16x128xf32>
    %c2 = arith.constant 2 : index
    %c0_46 = arith.constant 0 : index
    %108 = vector.load %arg16[%c2, %c0_46] : memref<46x128xf32, #tpu.memory_space<vmem>>, vector<16x128xf32>
    %c2_47 = arith.constant 2 : index
    %c0_48 = arith.constant 0 : index
    %109 = vector.load %arg9[%c2_47, %c0_48] : memref<31x128xf32, #tpu.memory_space<vmem>>, vector<1x128xf32>
    %110 = vector.shape_cast %109 : vector<1x128xf32> to vector<128xf32>
    %111 = vector.shape_cast %110 : vector<128xf32> to vector<1x128xf32>
    %112 = vector.broadcast %111 : vector<1x128xf32> to vector<16x128xf32>
    %113 = arith.mulf %108, %112 : vector<16x128xf32>
    %114 = arith.addf %92, %113 : vector<16x128xf32>
    %c3 = arith.constant 3 : index
    %c0_49 = arith.constant 0 : index
    %115 = vector.load %arg16[%c3, %c0_49] : memref<46x128xf32, #tpu.memory_space<vmem>>, vector<16x128xf32>
    %c3_50 = arith.constant 3 : index
    %c0_51 = arith.constant 0 : index
    %116 = vector.load %arg9[%c3_50, %c0_51] : memref<31x128xf32, #tpu.memory_space<vmem>>, vector<1x128xf32>
    %117 = vector.shape_cast %116 : vector<1x128xf32> to vector<128xf32>
    %118 = vector.shape_cast %117 : vector<128xf32> to vector<1x128xf32>
    %119 = vector.broadcast %118 : vector<1x128xf32> to vector<16x128xf32>
    %120 = arith.mulf %115, %119 : vector<16x128xf32>
    %121 = arith.addf %93, %120 : vector<16x128xf32>
    %c4 = arith.constant 4 : index
    %c0_52 = arith.constant 0 : index
    %122 = vector.load %arg16[%c4, %c0_52] : memref<46x128xf32, #tpu.memory_space<vmem>>, vector<16x128xf32>
    %c4_53 = arith.constant 4 : index
    %c0_54 = arith.constant 0 : index
    %123 = vector.load %arg9[%c4_53, %c0_54] : memref<31x128xf32, #tpu.memory_space<vmem>>, vector<1x128xf32>
    %124 = vector.shape_cast %123 : vector<1x128xf32> to vector<128xf32>
    %125 = vector.shape_cast %124 : vector<128xf32> to vector<1x128xf32>
    %126 = vector.broadcast %125 : vector<1x128xf32> to vector<16x128xf32>
    %127 = arith.mulf %122, %126 : vector<16x128xf32>
    %128 = arith.addf %100, %127 : vector<16x128xf32>
    %c5 = arith.constant 5 : index
    %c0_55 = arith.constant 0 : index
    %129 = vector.load %arg16[%c5, %c0_55] : memref<46x128xf32, #tpu.memory_space<vmem>>, vector<16x128xf32>
    %c5_56 = arith.constant 5 : index
    %c0_57 = arith.constant 0 : index
    %130 = vector.load %arg9[%c5_56, %c0_57] : memref<31x128xf32, #tpu.memory_space<vmem>>, vector<1x128xf32>
    %131 = vector.shape_cast %130 : vector<1x128xf32> to vector<128xf32>
    %132 = vector.shape_cast %131 : vector<128xf32> to vector<1x128xf32>
    %133 = vector.broadcast %132 : vector<1x128xf32> to vector<16x128xf32>
    %134 = arith.mulf %129, %133 : vector<16x128xf32>
    %135 = arith.addf %107, %134 : vector<16x128xf32>
    %c6 = arith.constant 6 : index
    %c0_58 = arith.constant 0 : index
    %136 = vector.load %arg16[%c6, %c0_58] : memref<46x128xf32, #tpu.memory_space<vmem>>, vector<16x128xf32>
    %c6_59 = arith.constant 6 : index
    %c0_60 = arith.constant 0 : index
    %137 = vector.load %arg9[%c6_59, %c0_60] : memref<31x128xf32, #tpu.memory_space<vmem>>, vector<1x128xf32>
    %138 = vector.shape_cast %137 : vector<1x128xf32> to vector<128xf32>
    %139 = vector.shape_cast %138 : vector<128xf32> to vector<1x128xf32>
    %140 = vector.broadcast %139 : vector<1x128xf32> to vector<16x128xf32>
    %141 = arith.mulf %136, %140 : vector<16x128xf32>
    %142 = arith.addf %114, %141 : vector<16x128xf32>
    %c7 = arith.constant 7 : index
    %c0_61 = arith.constant 0 : index
    %143 = vector.load %arg16[%c7, %c0_61] : memref<46x128xf32, #tpu.memory_space<vmem>>, vector<16x128xf32>
    %c7_62 = arith.constant 7 : index
    %c0_63 = arith.constant 0 : index
    %144 = vector.load %arg9[%c7_62, %c0_63] : memref<31x128xf32, #tpu.memory_space<vmem>>, vector<1x128xf32>
    %145 = vector.shape_cast %144 : vector<1x128xf32> to vector<128xf32>
    %146 = vector.shape_cast %145 : vector<128xf32> to vector<1x128xf32>
    %147 = vector.broadcast %146 : vector<1x128xf32> to vector<16x128xf32>
    %148 = arith.mulf %143, %147 : vector<16x128xf32>
    %149 = arith.addf %121, %148 : vector<16x128xf32>
    %c8 = arith.constant 8 : index
    %c0_64 = arith.constant 0 : index
    %150 = vector.load %arg16[%c8, %c0_64] : memref<46x128xf32, #tpu.memory_space<vmem>>, vector<16x128xf32>
    %c8_65 = arith.constant 8 : index
    %c0_66 = arith.constant 0 : index
    %151 = vector.load %arg9[%c8_65, %c0_66] : memref<31x128xf32, #tpu.memory_space<vmem>>, vector<1x128xf32>
    %152 = vector.shape_cast %151 : vector<1x128xf32> to vector<128xf32>
    %153 = vector.shape_cast %152 : vector<128xf32> to vector<1x128xf32>
    %154 = vector.broadcast %153 : vector<1x128xf32> to vector<16x128xf32>
    %155 = arith.mulf %150, %154 : vector<16x128xf32>
    %156 = arith.addf %128, %155 : vector<16x128xf32>
    %c9 = arith.constant 9 : index
    %c0_67 = arith.constant 0 : index
    %157 = vector.load %arg16[%c9, %c0_67] : memref<46x128xf32, #tpu.memory_space<vmem>>, vector<16x128xf32>
    %c9_68 = arith.constant 9 : index
    %c0_69 = arith.constant 0 : index
    %158 = vector.load %arg9[%c9_68, %c0_69] : memref<31x128xf32, #tpu.memory_space<vmem>>, vector<1x128xf32>
    %159 = vector.shape_cast %158 : vector<1x128xf32> to vector<128xf32>
    %160 = vector.shape_cast %159 : vector<128xf32> to vector<1x128xf32>
    %161 = vector.broadcast %160 : vector<1x128xf32> to vector<16x128xf32>
    %162 = arith.mulf %157, %161 : vector<16x128xf32>
    %163 = arith.addf %135, %162 : vector<16x128xf32>
    %c10 = arith.constant 10 : index
    %c0_70 = arith.constant 0 : index
    %164 = vector.load %arg16[%c10, %c0_70] : memref<46x128xf32, #tpu.memory_space<vmem>>, vector<16x128xf32>
    %c10_71 = arith.constant 10 : index
    %c0_72 = arith.constant 0 : index
    %165 = vector.load %arg9[%c10_71, %c0_72] : memref<31x128xf32, #tpu.memory_space<vmem>>, vector<1x128xf32>
    %166 = vector.shape_cast %165 : vector<1x128xf32> to vector<128xf32>
    %167 = vector.shape_cast %166 : vector<128xf32> to vector<1x128xf32>
    %168 = vector.broadcast %167 : vector<1x128xf32> to vector<16x128xf32>
    %169 = arith.mulf %164, %168 : vector<16x128xf32>
    %170 = arith.addf %142, %169 : vector<16x128xf32>
    %c11 = arith.constant 11 : index
    %c0_73 = arith.constant 0 : index
    %171 = vector.load %arg16[%c11, %c0_73] : memref<46x128xf32, #tpu.memory_space<vmem>>, vector<16x128xf32>
    %c11_74 = arith.constant 11 : index
    %c0_75 = arith.constant 0 : index
    %172 = vector.load %arg9[%c11_74, %c0_75] : memref<31x128xf32, #tpu.memory_space<vmem>>, vector<1x128xf32>
    %173 = vector.shape_cast %172 : vector<1x128xf32> to vector<128xf32>
    %174 = vector.shape_cast %173 : vector<128xf32> to vector<1x128xf32>
    %175 = vector.broadcast %174 : vector<1x128xf32> to vector<16x128xf32>
    %176 = arith.mulf %171, %175 : vector<16x128xf32>
    %177 = arith.addf %149, %176 : vector<16x128xf32>
    %c12 = arith.constant 12 : index
    %c0_76 = arith.constant 0 : index
    %178 = vector.load %arg16[%c12, %c0_76] : memref<46x128xf32, #tpu.memory_space<vmem>>, vector<16x128xf32>
    %c12_77 = arith.constant 12 : index
    %c0_78 = arith.constant 0 : index
    %179 = vector.load %arg9[%c12_77, %c0_78] : memref<31x128xf32, #tpu.memory_space<vmem>>, vector<1x128xf32>
    %180 = vector.shape_cast %179 : vector<1x128xf32> to vector<128xf32>
    %181 = vector.shape_cast %180 : vector<128xf32> to vector<1x128xf32>
    %182 = vector.broadcast %181 : vector<1x128xf32> to vector<16x128xf32>
    %183 = arith.mulf %178, %182 : vector<16x128xf32>
    %184 = arith.addf %156, %183 : vector<16x128xf32>
    %c13 = arith.constant 13 : index
    %c0_79 = arith.constant 0 : index
    %185 = vector.load %arg16[%c13, %c0_79] : memref<46x128xf32, #tpu.memory_space<vmem>>, vector<16x128xf32>
    %c13_80 = arith.constant 13 : index
    %c0_81 = arith.constant 0 : index
    %186 = vector.load %arg9[%c13_80, %c0_81] : memref<31x128xf32, #tpu.memory_space<vmem>>, vector<1x128xf32>
    %187 = vector.shape_cast %186 : vector<1x128xf32> to vector<128xf32>
    %188 = vector.shape_cast %187 : vector<128xf32> to vector<1x128xf32>
    %189 = vector.broadcast %188 : vector<1x128xf32> to vector<16x128xf32>
    %190 = arith.mulf %185, %189 : vector<16x128xf32>
    %191 = arith.addf %163, %190 : vector<16x128xf32>
    %c14 = arith.constant 14 : index
    %c0_82 = arith.constant 0 : index
    %192 = vector.load %arg16[%c14, %c0_82] : memref<46x128xf32, #tpu.memory_space<vmem>>, vector<16x128xf32>
    %c14_83 = arith.constant 14 : index
    %c0_84 = arith.constant 0 : index
    %193 = vector.load %arg9[%c14_83, %c0_84] : memref<31x128xf32, #tpu.memory_space<vmem>>, vector<1x128xf32>
    %194 = vector.shape_cast %193 : vector<1x128xf32> to vector<128xf32>
    %195 = vector.shape_cast %194 : vector<128xf32> to vector<1x128xf32>
    %196 = vector.broadcast %195 : vector<1x128xf32> to vector<16x128xf32>
    %197 = arith.mulf %192, %196 : vector<16x128xf32>
    %198 = arith.addf %170, %197 : vector<16x128xf32>
    %c15 = arith.constant 15 : index
    %c0_85 = arith.constant 0 : index
    %199 = vector.load %arg16[%c15, %c0_85] : memref<46x128xf32, #tpu.memory_space<vmem>>, vector<16x128xf32>
    %c15_86 = arith.constant 15 : index
    %c0_87 = arith.constant 0 : index
    %200 = vector.load %arg9[%c15_86, %c0_87] : memref<31x128xf32, #tpu.memory_space<vmem>>, vector<1x128xf32>
    %201 = vector.shape_cast %200 : vector<1x128xf32> to vector<128xf32>
    %202 = vector.shape_cast %201 : vector<128xf32> to vector<1x128xf32>
    %203 = vector.broadcast %202 : vector<1x128xf32> to vector<16x128xf32>
    %204 = arith.mulf %199, %203 : vector<16x128xf32>
    %205 = arith.addf %177, %204 : vector<16x128xf32>
    %c16 = arith.constant 16 : index
    %c0_88 = arith.constant 0 : index
    %206 = vector.load %arg16[%c16, %c0_88] : memref<46x128xf32, #tpu.memory_space<vmem>>, vector<16x128xf32>
    %c16_89 = arith.constant 16 : index
    %c0_90 = arith.constant 0 : index
    %207 = vector.load %arg9[%c16_89, %c0_90] : memref<31x128xf32, #tpu.memory_space<vmem>>, vector<1x128xf32>
    %208 = vector.shape_cast %207 : vector<1x128xf32> to vector<128xf32>
    %209 = vector.shape_cast %208 : vector<128xf32> to vector<1x128xf32>
    %210 = vector.broadcast %209 : vector<1x128xf32> to vector<16x128xf32>
    %211 = arith.mulf %206, %210 : vector<16x128xf32>
    %212 = arith.addf %184, %211 : vector<16x128xf32>
    %c17 = arith.constant 17 : index
    %c0_91 = arith.constant 0 : index
    %213 = vector.load %arg16[%c17, %c0_91] : memref<46x128xf32, #tpu.memory_space<vmem>>, vector<16x128xf32>
    %c17_92 = arith.constant 17 : index
    %c0_93 = arith.constant 0 : index
    %214 = vector.load %arg9[%c17_92, %c0_93] : memref<31x128xf32, #tpu.memory_space<vmem>>, vector<1x128xf32>
    %215 = vector.shape_cast %214 : vector<1x128xf32> to vector<128xf32>
    %216 = vector.shape_cast %215 : vector<128xf32> to vector<1x128xf32>
    %217 = vector.broadcast %216 : vector<1x128xf32> to vector<16x128xf32>
    %218 = arith.mulf %213, %217 : vector<16x128xf32>
    %219 = arith.addf %191, %218 : vector<16x128xf32>
    %c18 = arith.constant 18 : index
    %c0_94 = arith.constant 0 : index
    %220 = vector.load %arg16[%c18, %c0_94] : memref<46x128xf32, #tpu.memory_space<vmem>>, vector<16x128xf32>
    %c18_95 = arith.constant 18 : index
    %c0_96 = arith.constant 0 : index
    %221 = vector.load %arg9[%c18_95, %c0_96] : memref<31x128xf32, #tpu.memory_space<vmem>>, vector<1x128xf32>
    %222 = vector.shape_cast %221 : vector<1x128xf32> to vector<128xf32>
    %223 = vector.shape_cast %222 : vector<128xf32> to vector<1x128xf32>
    %224 = vector.broadcast %223 : vector<1x128xf32> to vector<16x128xf32>
    %225 = arith.mulf %220, %224 : vector<16x128xf32>
    %226 = arith.addf %198, %225 : vector<16x128xf32>
    %c19 = arith.constant 19 : index
    %c0_97 = arith.constant 0 : index
    %227 = vector.load %arg16[%c19, %c0_97] : memref<46x128xf32, #tpu.memory_space<vmem>>, vector<16x128xf32>
    %c19_98 = arith.constant 19 : index
    %c0_99 = arith.constant 0 : index
    %228 = vector.load %arg9[%c19_98, %c0_99] : memref<31x128xf32, #tpu.memory_space<vmem>>, vector<1x128xf32>
    %229 = vector.shape_cast %228 : vector<1x128xf32> to vector<128xf32>
    %230 = vector.shape_cast %229 : vector<128xf32> to vector<1x128xf32>
    %231 = vector.broadcast %230 : vector<1x128xf32> to vector<16x128xf32>
    %232 = arith.mulf %227, %231 : vector<16x128xf32>
    %233 = arith.addf %205, %232 : vector<16x128xf32>
    %c20 = arith.constant 20 : index
    %c0_100 = arith.constant 0 : index
    %234 = vector.load %arg16[%c20, %c0_100] : memref<46x128xf32, #tpu.memory_space<vmem>>, vector<16x128xf32>
    %c20_101 = arith.constant 20 : index
    %c0_102 = arith.constant 0 : index
    %235 = vector.load %arg9[%c20_101, %c0_102] : memref<31x128xf32, #tpu.memory_space<vmem>>, vector<1x128xf32>
    %236 = vector.shape_cast %235 : vector<1x128xf32> to vector<128xf32>
    %237 = vector.shape_cast %236 : vector<128xf32> to vector<1x128xf32>
    %238 = vector.broadcast %237 : vector<1x128xf32> to vector<16x128xf32>
    %239 = arith.mulf %234, %238 : vector<16x128xf32>
    %240 = arith.addf %212, %239 : vector<16x128xf32>
    %c21 = arith.constant 21 : index
    %c0_103 = arith.constant 0 : index
    %241 = vector.load %arg16[%c21, %c0_103] : memref<46x128xf32, #tpu.memory_space<vmem>>, vector<16x128xf32>
    %c21_104 = arith.constant 21 : index
    %c0_105 = arith.constant 0 : index
    %242 = vector.load %arg9[%c21_104, %c0_105] : memref<31x128xf32, #tpu.memory_space<vmem>>, vector<1x128xf32>
    %243 = vector.shape_cast %242 : vector<1x128xf32> to vector<128xf32>
    %244 = vector.shape_cast %243 : vector<128xf32> to vector<1x128xf32>
    %245 = vector.broadcast %244 : vector<1x128xf32> to vector<16x128xf32>
    %246 = arith.mulf %241, %245 : vector<16x128xf32>
    %247 = arith.addf %219, %246 : vector<16x128xf32>
    %c22 = arith.constant 22 : index
    %c0_106 = arith.constant 0 : index
    %248 = vector.load %arg16[%c22, %c0_106] : memref<46x128xf32, #tpu.memory_space<vmem>>, vector<16x128xf32>
    %c22_107 = arith.constant 22 : index
    %c0_108 = arith.constant 0 : index
    %249 = vector.load %arg9[%c22_107, %c0_108] : memref<31x128xf32, #tpu.memory_space<vmem>>, vector<1x128xf32>
    %250 = vector.shape_cast %249 : vector<1x128xf32> to vector<128xf32>
    %251 = vector.shape_cast %250 : vector<128xf32> to vector<1x128xf32>
    %252 = vector.broadcast %251 : vector<1x128xf32> to vector<16x128xf32>
    %253 = arith.mulf %248, %252 : vector<16x128xf32>
    %254 = arith.addf %226, %253 : vector<16x128xf32>
    %c23 = arith.constant 23 : index
    %c0_109 = arith.constant 0 : index
    %255 = vector.load %arg16[%c23, %c0_109] : memref<46x128xf32, #tpu.memory_space<vmem>>, vector<16x128xf32>
    %c23_110 = arith.constant 23 : index
    %c0_111 = arith.constant 0 : index
    %256 = vector.load %arg9[%c23_110, %c0_111] : memref<31x128xf32, #tpu.memory_space<vmem>>, vector<1x128xf32>
    %257 = vector.shape_cast %256 : vector<1x128xf32> to vector<128xf32>
    %258 = vector.shape_cast %257 : vector<128xf32> to vector<1x128xf32>
    %259 = vector.broadcast %258 : vector<1x128xf32> to vector<16x128xf32>
    %260 = arith.mulf %255, %259 : vector<16x128xf32>
    %261 = arith.addf %233, %260 : vector<16x128xf32>
    %c24 = arith.constant 24 : index
    %c0_112 = arith.constant 0 : index
    %262 = vector.load %arg16[%c24, %c0_112] : memref<46x128xf32, #tpu.memory_space<vmem>>, vector<16x128xf32>
    %c24_113 = arith.constant 24 : index
    %c0_114 = arith.constant 0 : index
    %263 = vector.load %arg9[%c24_113, %c0_114] : memref<31x128xf32, #tpu.memory_space<vmem>>, vector<1x128xf32>
    %264 = vector.shape_cast %263 : vector<1x128xf32> to vector<128xf32>
    %265 = vector.shape_cast %264 : vector<128xf32> to vector<1x128xf32>
    %266 = vector.broadcast %265 : vector<1x128xf32> to vector<16x128xf32>
    %267 = arith.mulf %262, %266 : vector<16x128xf32>
    %268 = arith.addf %240, %267 : vector<16x128xf32>
    %c25 = arith.constant 25 : index
    %c0_115 = arith.constant 0 : index
    %269 = vector.load %arg16[%c25, %c0_115] : memref<46x128xf32, #tpu.memory_space<vmem>>, vector<16x128xf32>
    %c25_116 = arith.constant 25 : index
    %c0_117 = arith.constant 0 : index
    %270 = vector.load %arg9[%c25_116, %c0_117] : memref<31x128xf32, #tpu.memory_space<vmem>>, vector<1x128xf32>
    %271 = vector.shape_cast %270 : vector<1x128xf32> to vector<128xf32>
    %272 = vector.shape_cast %271 : vector<128xf32> to vector<1x128xf32>
    %273 = vector.broadcast %272 : vector<1x128xf32> to vector<16x128xf32>
    %274 = arith.mulf %269, %273 : vector<16x128xf32>
    %275 = arith.addf %247, %274 : vector<16x128xf32>
    %c26 = arith.constant 26 : index
    %c0_118 = arith.constant 0 : index
    %276 = vector.load %arg16[%c26, %c0_118] : memref<46x128xf32, #tpu.memory_space<vmem>>, vector<16x128xf32>
    %c26_119 = arith.constant 26 : index
    %c0_120 = arith.constant 0 : index
    %277 = vector.load %arg9[%c26_119, %c0_120] : memref<31x128xf32, #tpu.memory_space<vmem>>, vector<1x128xf32>
    %278 = vector.shape_cast %277 : vector<1x128xf32> to vector<128xf32>
    %279 = vector.shape_cast %278 : vector<128xf32> to vector<1x128xf32>
    %280 = vector.broadcast %279 : vector<1x128xf32> to vector<16x128xf32>
    %281 = arith.mulf %276, %280 : vector<16x128xf32>
    %282 = arith.addf %254, %281 : vector<16x128xf32>
    %c27 = arith.constant 27 : index
    %c0_121 = arith.constant 0 : index
    %283 = vector.load %arg16[%c27, %c0_121] : memref<46x128xf32, #tpu.memory_space<vmem>>, vector<16x128xf32>
    %c27_122 = arith.constant 27 : index
    %c0_123 = arith.constant 0 : index
    %284 = vector.load %arg9[%c27_122, %c0_123] : memref<31x128xf32, #tpu.memory_space<vmem>>, vector<1x128xf32>
    %285 = vector.shape_cast %284 : vector<1x128xf32> to vector<128xf32>
    %286 = vector.shape_cast %285 : vector<128xf32> to vector<1x128xf32>
    %287 = vector.broadcast %286 : vector<1x128xf32> to vector<16x128xf32>
    %288 = arith.mulf %283, %287 : vector<16x128xf32>
    %289 = arith.addf %261, %288 : vector<16x128xf32>
    %c28 = arith.constant 28 : index
    %c0_124 = arith.constant 0 : index
    %290 = vector.load %arg16[%c28, %c0_124] : memref<46x128xf32, #tpu.memory_space<vmem>>, vector<16x128xf32>
    %c28_125 = arith.constant 28 : index
    %c0_126 = arith.constant 0 : index
    %291 = vector.load %arg9[%c28_125, %c0_126] : memref<31x128xf32, #tpu.memory_space<vmem>>, vector<1x128xf32>
    %292 = vector.shape_cast %291 : vector<1x128xf32> to vector<128xf32>
    %293 = vector.shape_cast %292 : vector<128xf32> to vector<1x128xf32>
    %294 = vector.broadcast %293 : vector<1x128xf32> to vector<16x128xf32>
    %295 = arith.mulf %290, %294 : vector<16x128xf32>
    %296 = arith.addf %268, %295 : vector<16x128xf32>
    %c29 = arith.constant 29 : index
    %c0_127 = arith.constant 0 : index
    %297 = vector.load %arg16[%c29, %c0_127] : memref<46x128xf32, #tpu.memory_space<vmem>>, vector<16x128xf32>
    %c29_128 = arith.constant 29 : index
    %c0_129 = arith.constant 0 : index
    %298 = vector.load %arg9[%c29_128, %c0_129] : memref<31x128xf32, #tpu.memory_space<vmem>>, vector<1x128xf32>
    %299 = vector.shape_cast %298 : vector<1x128xf32> to vector<128xf32>
    %300 = vector.shape_cast %299 : vector<128xf32> to vector<1x128xf32>
    %301 = vector.broadcast %300 : vector<1x128xf32> to vector<16x128xf32>
    %302 = arith.mulf %297, %301 : vector<16x128xf32>
    %303 = arith.addf %275, %302 : vector<16x128xf32>
    %c30 = arith.constant 30 : index
    %c0_130 = arith.constant 0 : index
    %304 = vector.load %arg16[%c30, %c0_130] : memref<46x128xf32, #tpu.memory_space<vmem>>, vector<16x128xf32>
    %c30_131 = arith.constant 30 : index
    %c0_132 = arith.constant 0 : index
    %305 = vector.load %arg9[%c30_131, %c0_132] : memref<31x128xf32, #tpu.memory_space<vmem>>, vector<1x128xf32>
    %306 = vector.shape_cast %305 : vector<1x128xf32> to vector<128xf32>
    %307 = vector.shape_cast %306 : vector<128xf32> to vector<1x128xf32>
    %308 = vector.broadcast %307 : vector<1x128xf32> to vector<16x128xf32>
    %309 = arith.mulf %304, %308 : vector<16x128xf32>
    %310 = arith.addf %282, %309 : vector<16x128xf32>
    %311 = arith.addf %296, %303 : vector<16x128xf32>
    %312 = arith.addf %311, %310 : vector<16x128xf32>
    %313 = arith.addf %312, %289 : vector<16x128xf32>
    %c0_133 = arith.constant 0 : index
    %c0_134 = arith.constant 0 : index
    %314 = vector.load %arg10[%c0_133, %c0_134] : memref<128x128xf32, #tpu.memory_space<vmem>>, vector<128x128xf32>
    %cst_135 = arith.constant dense<0.000000e+00> : vector<16x128xf32>
    %315 = tpu.matmul %313, %314, %cst_135 {dimension_numbers = #tpu.dot_dimension_numbers<[1], [0], [0], [1], [0, 0, 1, 1], [], []>} : vector<16x128xf32>, vector<128x128xf32>, vector<16x128xf32> -> vector<16x128xf32>
    %c0_136 = arith.constant 0 : index
    %c0_137 = arith.constant 0 : index
    %316 = vector.load %arg11[%c0_136, %c0_137] : memref<1x128xf32, #tpu.memory_space<vmem>>, vector<1x128xf32>
    %317 = vector.shape_cast %316 : vector<1x128xf32> to vector<128xf32>
    %318 = vector.shape_cast %317 : vector<128xf32> to vector<1x128xf32>
    %319 = vector.broadcast %318 : vector<1x128xf32> to vector<16x128xf32>
    %320 = arith.addf %315, %319 : vector<16x128xf32>
    %cst_138 = arith.constant 0.000000e+00 : f32
    %321 = vector.broadcast %cst_138 : f32 to vector<16x128xf32>
    %322 = arith.maximumf %320, %321 : vector<16x128xf32>
    %c0_139 = arith.constant 0 : index
    %c0_140 = arith.constant 0 : index
    %323 = vector.load %arg12[%c0_139, %c0_140] : memref<128x128xf32, #tpu.memory_space<vmem>>, vector<128x128xf32>
    %cst_141 = arith.constant dense<0.000000e+00> : vector<16x128xf32>
    %324 = tpu.matmul %322, %323, %cst_141 {dimension_numbers = #tpu.dot_dimension_numbers<[1], [0], [0], [1], [0, 0, 1, 1], [], []>} : vector<16x128xf32>, vector<128x128xf32>, vector<16x128xf32> -> vector<16x128xf32>
    %c0_142 = arith.constant 0 : index
    %c0_143 = arith.constant 0 : index
    %325 = vector.load %arg13[%c0_142, %c0_143] : memref<1x128xf32, #tpu.memory_space<vmem>>, vector<1x128xf32>
    %326 = vector.shape_cast %325 : vector<1x128xf32> to vector<128xf32>
    %327 = vector.shape_cast %326 : vector<128xf32> to vector<1x128xf32>
    %328 = vector.broadcast %327 : vector<1x128xf32> to vector<16x128xf32>
    %329 = arith.addf %324, %328 : vector<16x128xf32>
    %c0_144 = arith.constant 0 : index
    %c0_145 = arith.constant 0 : index
    %c0_146 = arith.constant 0 : index
    %330 = vector.load %arg14[%c0_144, %c0_145, %c0_146] : memref<1x16x128xf32, #tpu.memory_space<vmem>>, vector<1x16x128xf32>
    %331 = vector.shape_cast %330 : vector<1x16x128xf32> to vector<16x128xf32>
    %332 = vector.shape_cast %329 : vector<16x128xf32> to vector<1x16x128xf32>
    tpu.vector_store %arg14[%c0_144, %c0_145, %c0_146], %332 {strides = array<i32>} : memref<1x16x128xf32, #tpu.memory_space<vmem>>, vector<1x16x128xf32>,
    return
  }
  func.func @transform_1(%arg0: i32, %arg1: i32) -> (i32, i32) {
    %c0_i32 = arith.constant 0 : i32
    %c0_i32_0 = arith.constant 0 : i32
    %c0_i32_1 = arith.constant 0 : i32
    return %c0_i32, %c0_i32_0 : i32, i32
  }
  func.func @transform_2(%arg0: i32, %arg1: i32) -> (i32, i32) {
    %c0_i32 = arith.constant 0 : i32
    %c0_i32_0 = arith.constant 0 : i32
    %c0_i32_1 = arith.constant 0 : i32
    return %c0_i32, %c0_i32_0 : i32, i32
  }
  func.func @transform_3(%arg0: i32, %arg1: i32) -> (i32, i32) {
    %c0_i32 = arith.constant 0 : i32
    %c0_i32_0 = arith.constant 0 : i32
    %c0_i32_1 = arith.constant 0 : i32
    return %c0_i32, %c0_i32_0 : i32, i32
  }
  func.func @transform_4(%arg0: i32, %arg1: i32) -> (i32, i32) {
    %c0_i32 = arith.constant 0 : i32
    %c0_i32_0 = arith.constant 0 : i32
    %c0_i32_1 = arith.constant 0 : i32
    return %c0_i32, %c0_i32_0 : i32, i32
  }
  func.func @transform_5(%arg0: i32, %arg1: i32) -> (i32, i32) {
    %c0_i32 = arith.constant 0 : i32
    %c0_i32_0 = arith.constant 0 : i32
    %c0_i32_1 = arith.constant 0 : i32
    return %c0_i32, %c0_i32_0 : i32, i32
  }
  func.func @transform_6(%arg0: i32, %arg1: i32) -> (i32, i32) {
    %c0_i32 = arith.constant 0 : i32
    %c0_i32_0 = arith.constant 0 : i32
    %c0_i32_1 = arith.constant 0 : i32
    return %c0_i32, %c0_i32_0 : i32, i32
  }
  func.func @transform_7(%arg0: i32, %arg1: i32) -> (i32, i32) {
    %c0_i32 = arith.constant 0 : i32
    %c0_i32_0 = arith.constant 0 : i32
    %c0_i32_1 = arith.constant 0 : i32
    return %c0_i32, %c0_i32_0 : i32, i32
  }
  func.func @transform_8(%arg0: i32, %arg1: i32) -> (i32, i32) {
    %c0_i32 = arith.constant 0 : i32
    %c0_i32_0 = arith.constant 0 : i32
    %c0_i32_1 = arith.constant 0 : i32
    return %c0_i32, %c0_i32_0 : i32, i32
  }
  func.func @transform_9(%arg0: i32, %arg1: i32) -> (i32, i32) {
    %c0_i32 = arith.constant 0 : i32
    %c0_i32_0 = arith.constant 0 : i32
    %c0_i32_1 = arith.constant 0 : i32
    return %c0_i32, %c0_i32_0 : i32, i32
  }
  func.func @transform_10(%arg0: i32, %arg1: i32) -> (i32, i32) {
    %c0_i32 = arith.constant 0 : i32
    %c0_i32_0 = arith.constant 0 : i32
    %c0_i32_1 = arith.constant 0 : i32
    return %c0_i32, %c0_i32_0 : i32, i32
  }
  func.func @transform_11(%arg0: i32, %arg1: i32) -> (i32, i32) {
    %c0_i32 = arith.constant 0 : i32
    %c0_i32_0 = arith.constant 0 : i32
    %c0_i32_1 = arith.constant 0 : i32
    return %c0_i32, %c0_i32_0 : i32, i32
  }
  func.func @transform_12(%arg0: i32, %arg1: i32) -> (i32, i32, i32) {
    %c0_i32 = arith.constant 0 : i32
    %c0_i32_0 = arith.constant 0 : i32
    return %arg0, %arg1, %c0_i32 : i32, i32, i32
  }
}

</mosaic_0001>

<bundles_post_ra>
// kernel: tpu_custom_call.1
= control target key start
LH: loop header
LB: loop body
LE: loop exit
PB: predicated region body
PF: predicated region fallthrough
CT: control target
= control target key end

     0   :  { %17 = vsyncpa [#allocation6], 0  ;;  %s2886_s0 = inlined_call_operand.vmem [shape: f32[2,78,128], index: 0, kind: input, shape index: {}]   ;;  %s2887_s1 = inlined_call_operand.vmem [shape: f32[1,128], index: 1, kind: input, shape index: {}]   ;;  %s2888_s2 = inlined_call_operand.vmem [shape: f32[1,128], index: 2, kind: input, shape index: {}]   ;;  %s2889_s3 = inlined_call_operand.vmem [shape: f32[128,128], index: 3, kind: input, shape index: {}]   ;;  %s2890_s4 = inlined_call_operand.vmem [shape: f32[1,128], index: 4, kind: input, shape index: {}]   ;;  %s2891_s5 = inlined_call_operand.vmem [shape: f32[128,128], index: 5, kind: input, shape index: {}]   ;;  %s2892_s6 = inlined_call_operand.vmem [shape: f32[1,128], index: 6, kind: input, shape index: {}]   ;;  %s2893_s7 = inlined_call_operand.vmem [shape: f32[31,128], index: 7, kind: input, shape index: {}]   ;;  %s2894_s8 = inlined_call_operand.hbm [shape: f32[128,128], index: 8, kind: input, shape index: {}]   ;;  %s2895_s9 = inlined_call_operand.vmem [shape: f32[1,128], index: 9, kind: input, shape index: {}]   ;;  %s2896_s10 = inlined_call_operand.hbm [shape: f32[128,128], index: 10, kind: input, shape index: {}]   ;;  %s2897_s11 = inlined_call_operand.vmem [shape: f32[1,128], index: 11, kind: input, shape index: {}]   ;;  %s2898_s12 = inlined_call_operand.hbm [shape: f32[2,48,128], index: 12, kind: output, shape index: {}]  }
   0x1   :  { %18 = vsyncpa [#allocation9], 0 }
   0x2   :  { %19 = vsyncpa [#allocation7], 0 }
   0x3   :  { %21 = vsyncpa [#allocation7 + $0x1], 0  ;;  %s2382_s21 = smov 0   ;;  %s2384_s22 = smov 0  }
   0x4   :  { %s2386_s23 = smov 0   ;;  %s2388_s24 = smov 0  }
   0x5   :  { %s2390_s25 = smov 0   ;;  %s2392_s26 = smov 0  }
   0x6   :  { %s2394_s27 = smov 0   ;;  %s2396_s28 = smov 0  }
   0x7 LB: > { %2906 = sst [smem:[#allocation17_spill]] %s2280_s21  ;;  %s1713_s29 = sadd.s32 4294967295, %s2308_s28   ;;  %s2308_s28 = sphi %s2396_s28, %s27_s28   ;;  %s2304_s27 = sphi %s2394_s27, %s2930_s27   ;;  %s2300_s26 = sphi %s2392_s26, %s2934_s26   ;;  %s2296_s25 = sphi %s2390_s25, %s2928_s25   ;;  %s2292_s24 = sphi %s2388_s24, %s2927_s24   ;;  %s2288_s23 = sphi %s2386_s23, %s2933_s23   ;;  %s2284_s22 = sphi %s2384_s22, %s2932_s22   ;;  %s2280_s21 = sphi %s2382_s21, %s2931_s21  }
   0x8   : > { %2907 = sst [smem:[#allocation18_spill]] %s2288_s23  ;;  %s1714_s30 = sadd.s32 4294967294, %s2308_s28  }
   0x9   : > { %2908 = sst [smem:[#allocation19_spill]] %s2300_s26  ;;  %s36_s13 = sadd.s32 1, %s2300_s26 }
   0xa   : > { %2909 = sst [smem:[#allocation20_spill]] %s2304_s27  ;;  %s39_s14 = sadd.s32 1, %s2304_s27 }
   0xb   : > { %p37_p0 = scmp.ge.s32.totalorder %s36_s13, 3  ;;  %s279_s15 = sadd.s32 1, %s2288_s23 }
   0xc   : > { %p289_p1 = scmp.ne.s32.totalorder %s2288_s23, %s2284_s22  ;;  %p290_p2 = scmp.eq.s32.totalorder %s1713_s29, 5 }
   0xd   : > { %s2936_s13 = smov (%p37_p0, %s36_s13), 0  ;;  %s2938_s14 = smov (!%p37_p0, %s39_s14), %s2304_s27 }
   0xe   : > { %2910 = sst [smem:[#allocation21_spill]] %s2936_s13  ;;  %s275_s16 = ssub.s32 %s2300_s26, %s2936_s13 }
   0xf   : > { %p2434_p3 = por %p290_p2, %p289_p1  ;;  %p41_p4 = scmp.ge.s32.totalorder %s2938_s14, 2 }
  0x10   : > { %p295_p5 = scmp.ne.s32.totalorder %s2284_s22, %s2280_s21  ;;  %p296_p6 = scmp.eq.s32.totalorder %s1714_s30, 5 }
  0x11   : > { %p1715_p7 = scmp.ge.s32.totalorder %s2308_s28, 1  ;;  %s2940_s14 = smov (%p41_p4, %s2938_s14), 0 }
  0x12   : > { %2912 = sst [smem:[#allocation22_spill]] %s2940_s14  ;;  %p2443_p8 = por %p296_p6, %p295_p5 }
  0x13   : > { %p303_p9 = scmp.lt.s32.totalorder %s2308_s28, 7  ;;  %s274_s19 = ssub.s32 %s2304_s27, %s2940_s14 }
  0x14   : > { %s2913_s18 = scalar_select %p2443_p8, 1, 0 }
  0x15   : > { %s276_s20 = sor.u32 %s275_s16, %s274_s19  ;;  %p2450_p10 = pnand %p1715_p7, %p303_p9 }
  0x16   : > { %2914 = sst [smem:[#allocation23_spill]] %s2913_s18  ;;  %p277_p11 = scmp.eq.s32.totalorder %s276_s20, 0 }
  0x17   : > { %p2454_p12 = scmp.eq.s32.totalorder %s1713_s29, 0  ;;  %p2032_p13 = pneg %p2450_p10 }
  0x18   : > { %s2461_s30 = scalar_select %p277_p11, %s2288_s23, %s279_s15  }
  0x19   : > { %s2310_s21 = smov [#allocation5]   ;;  %p2465_p0 = pnand %p2454_p12, %p2032_p13 }
  0x1a   : > { %2917 = sst [smem:[#allocation24_spill]] %s2461_s30  ;;  %s336_s18 = sshll.u32 %s2310_s21, 4  ;;  %s337_s18 = int_to_ptr.vmem [resolvable:$true] %s336_s18 }
  0x1b   : > { %p2156_p1 = pneg %p2465_p0  ;;  %s2165_s29 = scalar_lea.vmem %s337_s18, 2048 }
  0x1c   : > { %p2166_p2 = scmp.ne.s32.totalorder %s337_s18, %s2165_s29  ;;  %p2173_p6 = scmp.lt.s32.totalorder %s337_s18, %s337_s18 }
  0x1d   : > { %p2174_p7 = scmp.lt.s32.totalorder %s2165_s29, %s2165_s29 }
  0x1e   : > { %p2168_p4 = pnand %p2166_p2, %p2156_p1 }
  0x1f   : > { %p2175_p9 = por %p2174_p7, %p2173_p6 }
  0x20   : > { %p2169_p5 = pneg %p2168_p4 }
  0x22   : > { %p2176_p11 = pnand %p2175_p9, %p2169_p5 }
  0x24   : > { %2179 = shalt.err (!%p2176_p11)
}
  0x25   : > { %s2311_s21 = smov 128   ;;  %s2312_s15 = smov 8  }
  0x26   : > { %2035 = dma.hbm_to_vmem [thread:$0]  (!%p2465_p0), %s2894_s8, 2048, %s337_s18, [#allocation6], %s2311_s21, %s2311_s21, %s2312_s15  }
  0x27   : > { %s2313_s14 = smov [#allocation8]  }
  0x28   : > { %s352_s27 = sshll.u32 %s2313_s14, 4  ;;  %s353_s27 = int_to_ptr.vmem [resolvable:$true] %s352_s27 }
  0x29   : > { %s2191_s30 = scalar_lea.vmem %s353_s27, 2048  ;;  %p2199_p5 = scmp.lt.s32.totalorder %s353_s27, %s353_s27 }
  0x2a   : > { %p2192_p13 = scmp.ne.s32.totalorder %s353_s27, %s2191_s30  ;;  %p2200_p6 = scmp.lt.s32.totalorder %s2191_s30, %s2191_s30 }
  0x2c   : > { %p2194_p2 = pnand %p2192_p13, %p2156_p1  ;;  %p2201_p7 = por %p2200_p6, %p2199_p5 }
  0x2e   : > { %p2195_p4 = pneg %p2194_p2 }
  0x30   : > { %p2202_p9 = pnand %p2201_p7, %p2195_p4 }
  0x32   : > { %2205 = shalt.err (!%p2202_p9)
}
  0x33   : > { %2038 = dma.hbm_to_vmem [thread:$0]  (!%p2465_p0), %s2896_s10, 2048, %s353_s27, [#allocation9], %s2311_s21, %s2311_s21, %s2312_s15  }
  0x34   : > { %371 = sbr.rel (%p2450_p10) target bundleno = 958 (0x3be), region = 64 }
  0x39   : > { %2265 = dma.done.wait (%p2454_p12), [#allocation6], 2048  }
  0x3a   : > { %2267 = vsyncadd (%p2454_p12), [#allocation6], 4294965248 }
  0x3b   : > { %2269 = dma.done.wait (%p2454_p12), [#allocation9], 2048  }
  0x3c   : > { %2271 = vsyncadd (%p2454_p12), [#allocation9], 4294965248  ;;  %s407_s23 = sand.u32 1, %s2284_s22   ;;  %p411_p0 = scmp.lt.s32.totalorder %s2292_s24, 0 }
  0x3d   : > { %s1721_s27 = sshll.u32 %s407_s23, 4  ;;  %s412_s13 = ssub.s32 0, %s2292_s24 }
  0x3e   : > { %s1722_s14 = smin.u32 %s2292_s24, %s412_s13  ;;  %s2505_s26 = scalar_lea.vmem [#allocation10], %s1721_s27 }
  0x3f   : > { %s414_s18 = sand.u32 1, %s1722_s14   ;;  %p1725_p12 = scmp.ne.s32.totalorder %s2292_s24, 0 }
  0x40   : > { %s415_s30 = ssub.s32 0, %s414_s18  ;;  %s427_s21 = smul.u32 (!%p1725_p12), 80, %s2296_s25 }
  0x41   : > { %s2942_s30 = smov (!%p411_p0, %s415_s30), %s414_s18  ;;  %426 = sbr.rel (%p1725_p12) target bundleno = 75 (0x4b), region = 76 }
  0x42   : > { %p1724_p10 = scmp.lt.s32.totalorder %s2942_s30, 0  ;;  %s421_s16 = sadd.s32 2, %s2942_s30 }
  0x43   : > { %s429_s20 = scalar_lea.vmem (!%p1725_p12), %s2886_s0, %s427_s21 }
  0x44   : > { %s2944_s16 = smov (!%p1724_p10, %s421_s16), %s2942_s30 }
  0x46   : > { %v468_v0 = vld [vmem:[%s429_s20] sm:$0xff]  ;;  %v470_v1 = vld [vmem:[%s429_s20 + $0x8] sm:$0xff]  ;;  %v472_v2 = vld [vmem:[%s429_s20 + $0x10] sm:$0xff] }
  0x47   : > { %469 = vst [vmem:[#allocation2] sm:$0xff] %v468_v0  ;;  %471 = vst [vmem:[#allocation2 + $0x8] sm:$0xff] %v470_v1  ;;  %v474_v3 = vld [vmem:[%s429_s20 + $0x18] sm:$0xff]  ;;  %v476_v4 = vld [vmem:[%s429_s20 + $0x20] sm:$0xff] }
  0x48   : > { %473 = vst [vmem:[#allocation2 + $0x10] sm:$0xff] %v472_v2  ;;  %v1726_v5 = vld [vmem:[%s429_s20 + $0x28] sm:$0x3f]  ;;  %475 = vst [vmem:[#allocation2 + $0x18] sm:$0xff] %v474_v3 }
  0x49   : > { %477 = vst [vmem:[#allocation2 + $0x20] sm:$0xff] %v476_v4  ;;  %489 = vst [vmem:[#allocation2 + $0x28] sm:$0x3f] %v1726_v5 }
  0x4a   : > { %493 = vsyncadd [#allocation4], 736 }
  0x4b PF: > { %s494_s29 = sadd.s32 1, %s2292_s24 }
  0x4c   : > { %p1727_p1 = scmp.ge.s32.totalorder %s494_s29, 3 }
  0x4d   : > { %s499_s27 = ssub.s32 (!%p1727_p1), 1, %s2944_s16  ;;  %s1728_s13 = sshll.u32 (!%p1727_p1), %s2292_s24, 4 }
  0x4e   : > { %498 = sbr.rel (%p1727_p1) target bundleno = 88 (0x58), region = 117  ;;  %s506_s29 = scalar_lea.sflag (!%p1727_p1), [#allocation4], %s499_s27 }
  0x4f   : > { %s1621_s14 = smul.u32 (!%p1727_p1), 80, %s2296_s25 }
  0x50   : > { %s504_s18 = smul.u32 (!%p1727_p1), 48, %s499_s27 }
  0x51   : > { %s1622_s30 = sadd.s32 (!%p1727_p1), %s1728_s13, %s1621_s14 }
  0x52   : > { %s1623_s19 = scalar_lea.vmem (!%p1727_p1), %s2886_s0, %s1622_s30  ;;  %s505_s20 = scalar_lea.vmem (!%p1727_p1), [#allocation2], %s504_s18 }
  0x53   : > { %v1730_v6 = vld [vmem:[%s1623_s19 + $0x10] sm:$0xff]  ;;  %v1731_v7 = vld [vmem:[%s1623_s19 + $0x18] sm:$0xff]  ;;  %v1732_v8 = vld [vmem:[%s1623_s19 + $0x20] sm:$0xff] }
  0x54   : > { %546 = vst [vmem:[%s505_s20] sm:$0xff] %v1730_v6  ;;  %548 = vst [vmem:[%s505_s20 + $0x8] sm:$0xff] %v1731_v7  ;;  %v1733_v9 = vld [vmem:[%s1623_s19 + $0x28] sm:$0xff]  ;;  %v1734_v10 = vld [vmem:[%s1623_s19 + $0x30] sm:$0xff] }
  0x55   : > { %550 = vst [vmem:[%s505_s20 + $0x10] sm:$0xff] %v1732_v8  ;;  %v1735_v11 = vld [vmem:[%s1623_s19 + $0x38] sm:$0x3f]  ;;  %552 = vst [vmem:[%s505_s20 + $0x18] sm:$0xff] %v1733_v9 }
  0x56   : > { %554 = vst [vmem:[%s505_s20 + $0x20] sm:$0xff] %v1734_v10  ;;  %1736 = vst [vmem:[%s505_s20 + $0x28] sm:$0x3f] %v1735_v11 }
  0x57   : > { %570 = vsyncadd %s506_s29, 736 }
  0x58 PF: > { %s571_s13 = smul.u32 48, %s2944_s16  ;;  %s573_s30 = scalar_lea.sflag [#allocation4], %s2944_s16 }
  0x5a   : > { %s572_s14 = scalar_lea.vmem [#allocation2], %s571_s13 }
  0x5b   : > { %2272 = dma.done.wait %s573_s30, 736 }
  0x5c   : > { %2273 = vsyncadd %s573_s30, 4294966560  ;;  %vm593_vm0 = vcmask 1045504   ;;  %v711_v24 = vld [vmem:[%s2889_s3 + $0x78] sm:$0xff]  ;;  %v710_v26 = vld [vmem:[%s2889_s3 + $0x70] sm:$0xff]  ;;  %s1748_s15 = sshll.u32 %s2292_s24, 4  ;;  %s2021_s19 = smul.u32 6, %s2296_s25 }
  0x5d   : > { %v2521_v12 = vld [vmem:[%s572_s14 + $0x18] sm:$0xff]  ;;  %v2523_v13 = vld [vmem:[%s572_s14] sm:$0xff]  ;;  %v2529_v15 = vld [vmem:[%s572_s14 + $0x8] sm:$0xff]  ;;  %1869 = vmatprep.subr.mxu0 %v711_v24  ;;  %s1783_s20 = sshll.u32 %s2292_s24, 1  ;;  %s1572_s30 = sshll.u32 %s2505_s26, 4  ;;  %s2824_s30 = int_to_ptr.vmem [resolvable:$true] %s1572_s30 }
  0x5e   : > { %589 = vadd.xlane.f32.xlu1 %v2521_v12  ;;  %583 = vadd.xlane.f32.xlu0 %v2523_v13  ;;  %v603_v14 = vmul.f32 %v2523_v13, %v2523_v13  ;;  %v604_v16 = vmul.f32 %v2529_v15, %v2529_v15  ;;  %v2534_v17 = vld [vmem:[%s572_s14 + $0x10] sm:$0xff]  ;;  %v606_v19 = vmul.f32 %v2521_v12, %v2521_v12  ;;  %v2541_v20 = vld [vmem:[%s572_s14 + $0x28] sm:$0x3f]  ;;  %v2543_v21 = vld [vmem:[%s572_s14 + $0x20] sm:$0xff]  ;;  %s1569_s29 = sadd.s32 %s2021_s19, %s1783_s20  ;;  %s2835_s18 = scalar_lea.sflag [#allocation7], %s407_s23 }
  0x5f   : > { %v605_v18 = vmul.f32 %v2534_v17, %v2534_v17  ;;  %v594_v22 = vsel %vm593_vm0, %v2541_v20, 0.0  ;;  %v608_v23 = vmul.f32 %v2541_v20, %v2541_v20  ;;  %v829_v25 = vld [vmem:[%s2891_s5 + $0x78] sm:$0xff]  ;;  %1870 = vmatpush3.msra.mxu0 %v711_v24  ;;  %v828_v27 = vld [vmem:[%s2891_s5 + $0x70] sm:$0xff]  ;;  %v607_v28 = vmul.f32 %v2543_v21, %v2543_v21  ;;  %v709_v30 = vld [vmem:[%s2889_s3 + $0x68] sm:$0xff]  ;;  %s1784_s16 = sshll.u32 %s1569_s29, 7  ;;  %s2206_s21 = scalar_lea.vmem %s2824_s30, 256 }
  0x60   : > { %1910 = vmatprep.subr.mxu1 %v829_v25  ;;  %1871 = vmatprep.subr.mxu0 %v710_v26  ;;  %v827_v31 = vld [vmem:[%s2891_s5 + $0x68] sm:$0xff]  ;;  %v708_v32 = vld [vmem:[%s2889_s3 + $0x60] sm:$0xff]  ;;  %v707_v34 = vld [vmem:[%s2889_s3 + $0x58] sm:$0xff]  ;;  %s2830_s27 = scalar_lea.hbm %s2898_s12, %s1784_s16  ;;  %p2207_p11 = scmp.ne.s32.totalorder %s2824_s30, %s2206_s21 }
  0x61   : > { %1911 = vmatpush3.msra.mxu1 %v829_v25  ;;  %v619_v29 = vsel %vm593_vm0, %v608_v23, 0.0  ;;  %1872 = vmatpush3.msra.mxu0 %v710_v26  ;;  %v826_v33 = vld [vmem:[%s2891_s5 + $0x60] sm:$0xff]  ;;  %v825_v35 = vld [vmem:[%s2891_s5 + $0x58] sm:$0xff]  ;;  %v706_v36 = vld [vmem:[%s2889_s3 + $0x50] sm:$0xff] }
  0x62   : > { %585 = vadd.xlane.f32.xlu0 %v2529_v15  ;;  %609 = vadd.xlane.f32.xlu1 %v603_v14  ;;  %v824_v37 = vld [vmem:[%s2891_s5 + $0x50] sm:$0xff]  ;;  %v705_v38 = vld [vmem:[%s2889_s3 + $0x48] sm:$0xff]  ;;  %v704_v40 = vld [vmem:[%s2889_s3 + $0x40] sm:$0xff]  ;;  %p2208_p13 = pnand %p2207_p11, %p2434_p3 }
  0x63   : > { %1912 = vmatprep.subr.mxu1 %v828_v27  ;;  %1873 = vmatprep.subr.mxu0 %v709_v30  ;;  %v823_v39 = vld [vmem:[%s2891_s5 + $0x48] sm:$0xff]  ;;  %v822_v41 = vld [vmem:[%s2891_s5 + $0x40] sm:$0xff]  ;;  %v703_v42 = vld [vmem:[%s2889_s3 + $0x38] sm:$0xff] }
  0x64   : > { %1913 = vmatpush3.msra.mxu1 %v828_v27  ;;  %1874 = vmatpush3.msra.mxu0 %v709_v30  ;;  %v821_v43 = vld [vmem:[%s2891_s5 + $0x38] sm:$0xff]  ;;  %v702_v44 = vld [vmem:[%s2889_s3 + $0x30] sm:$0xff]  ;;  %v701_v46 = vld [vmem:[%s2889_s3 + $0x28] sm:$0xff]  ;;  %p2209_p2 = pneg %p2208_p13 }
  0x65   : > { %1914 = vmatprep.subr.mxu1 %v827_v31  ;;  %1875 = vmatprep.subr.mxu0 %v708_v32  ;;  %v820_v45 = vld [vmem:[%s2891_s5 + $0x30] sm:$0xff]  ;;  %v819_v47 = vld [vmem:[%s2891_s5 + $0x28] sm:$0xff]  ;;  %v700_v48 = vld [vmem:[%s2889_s3 + $0x20] sm:$0xff] }
  0x66   : > { %587 = vadd.xlane.f32.xlu0 %v2534_v17  ;;  %611 = vadd.xlane.f32.xlu1 %v604_v16  ;;  %v818_v49 = vld [vmem:[%s2891_s5 + $0x20] sm:$0xff]  ;;  %v699_v50 = vld [vmem:[%s2889_s3 + $0x18] sm:$0xff]  ;;  %v698_v52 = vld [vmem:[%s2889_s3 + $0x10] sm:$0xff] }
  0x67   : > { %1915 = vmatpush3.msra.mxu1 %v827_v31  ;;  %1876 = vmatpush3.msra.mxu0 %v708_v32  ;;  %v817_v51 = vld [vmem:[%s2891_s5 + $0x18] sm:$0xff]  ;;  %v816_v53 = vld [vmem:[%s2891_s5 + $0x10] sm:$0xff]  ;;  %v697_v54 = vld [vmem:[%s2889_s3 + $0x8] sm:$0xff] }
  0x68   : > { %1916 = vmatprep.subr.mxu1 %v826_v33  ;;  %1877 = vmatprep.subr.mxu0 %v707_v34  ;;  %v815_v55 = vld [vmem:[%s2891_s5 + $0x8] sm:$0xff]  ;;  %v696_v56 = vld [vmem:[%s2889_s3] sm:$0xff] }
  0x69   : > { %1917 = vmatpush3.msra.mxu1 %v826_v33  ;;  %1878 = vmatpush3.msra.mxu0 %v707_v34  ;;  %v814_v57 = vld [vmem:[%s2891_s5] sm:$0xff] }
  0x6a   : > { %613 = vadd.xlane.f32.xlu0 %v605_v18  ;;  %615 = vadd.xlane.f32.xlu1 %v606_v19 }
  0x6b   : > { %1918 = vmatprep.subr.mxu1 %v825_v35  ;;  %1879 = vmatprep.subr.mxu0 %v706_v36 }
  0x6c   : > { %1919 = vmatpush3.msra.mxu1 %v825_v35  ;;  %1880 = vmatpush3.msra.mxu0 %v706_v36 }
  0x6d   : > { %1920 = vmatprep.subr.mxu1 %v824_v37  ;;  %1881 = vmatprep.subr.mxu0 %v705_v38 }
  0x6e   : > { %591 = vadd.xlane.f32.xlu0 %v2543_v21  ;;  %595 = vadd.xlane.f32.xlu1 %v594_v22 }
  0x6f   : > { %1921 = vmatpush3.msra.mxu1 %v824_v37  ;;  %1882 = vmatpush3.msra.mxu0 %v705_v38 }
  0x70   : > { %1922 = vmatprep.subr.mxu1 %v823_v39  ;;  %1883 = vmatprep.subr.mxu0 %v704_v40 }
  0x71   : > { %1923 = vmatpush3.msra.mxu1 %v823_v39  ;;  %1884 = vmatpush3.msra.mxu0 %v704_v40 }
  0x72   : > { %617 = vadd.xlane.f32.xlu0 %v607_v28  ;;  %620 = vadd.xlane.f32.xlu1 %v619_v29 }
  0x73   : > { %1924 = vmatprep.subr.mxu1 %v822_v41  ;;  %1885 = vmatprep.subr.mxu0 %v703_v42 }
  0x74   : > { %1925 = vmatpush3.msra.mxu1 %v822_v41  ;;  %1886 = vmatpush3.msra.mxu0 %v703_v42 }
  0x75   : > { %1926 = vmatprep.subr.mxu1 %v821_v43  ;;  %1887 = vmatprep.subr.mxu0 %v702_v44 }
  0x76   : > { %1927 = vmatpush3.msra.mxu1 %v821_v43  ;;  %1888 = vmatpush3.msra.mxu0 %v702_v44 }
  0x77   : > { %1928 = vmatprep.subr.mxu1 %v820_v45  ;;  %1889 = vmatprep.subr.mxu0 %v701_v46 }
  0x78   : > { %1929 = vmatpush3.msra.mxu1 %v820_v45  ;;  %1890 = vmatpush3.msra.mxu0 %v701_v46 }
  0x79   : > { %1930 = vmatprep.subr.mxu1 %v819_v47  ;;  %1891 = vmatprep.subr.mxu0 %v700_v48 }
  0x7a   : > { %1931 = vmatpush3.msra.mxu1 %v819_v47  ;;  %1892 = vmatpush3.msra.mxu0 %v700_v48  ;;  %v1738_v48 = vld [vmem:[%s2887_s1] ss:$0 sm:$0xff] }
  0x7b   : > { %1932 = vmatprep.subr.mxu1 %v818_v49  ;;  %1893 = vmatprep.subr.mxu0 %v699_v50 }
  0x7c   : > { %1933 = vmatpush3.msra.mxu1 %v818_v49  ;;  %1894 = vmatpush3.msra.mxu0 %v699_v50 }
  0x7d   : > { %1934 = vmatprep.subr.mxu1 %v817_v51  ;;  %1895 = vmatprep.subr.mxu0 %v698_v52 }
  0x7e   : > { %1935 = vmatpush3.msra.mxu1 %v817_v51  ;;  %1896 = vmatpush3.msra.mxu0 %v698_v52  ;;  %v1739_v52 = vld [vmem:[%s2888_s2] ss:$0 sm:$0xff] }
  0x7f   : > { %1936 = vmatprep.subr.mxu1 %v816_v53  ;;  %1897 = vmatprep.subr.mxu0 %v697_v54 }
  0x80   : > { %1937 = vmatpush3.msra.mxu1 %v816_v53  ;;  %1898 = vmatpush3.msra.mxu0 %v697_v54 }
  0x81   : > { %1938 = vmatprep.subr.mxu1 %v815_v55  ;;  %1899 = vmatprep.subr.mxu0 %v696_v56 }
  0x82   : > { %1939 = vmatpush3.msra.mxu1 %v815_v55  ;;  %1900 = vmatpush3.msra.mxu0 %v696_v56 }
  0x83   : > { %1940 = vmatprep.subr.mxu1 %v814_v57 }
  0x84   : > { %1941 = vmatpush3.msra.mxu1 %v814_v57 }
  0xe7   : > { %v590_v58 = vpop.xlane.xlu1 %589  ;;  %v584_v59 = vpop.xlane.xlu0 %583 }
  0xe8   : > { %v597_v60 = vmul.f32 0.03125, %v584_v59  ;;  %v2649_v3 = vmul.f32 0.03125, %v590_v58 }
  0xea   : > { %v628_v63 = vmul.f32 %v597_v60, %v597_v60  ;;  %v631_v14 = vmul.f32 %v2649_v3, %v2649_v3  ;;  %v646_v44 = vsub.f32 %v2523_v13, %v597_v60  ;;  %v649_v60 = vsub.f32 %v2521_v12, %v2649_v3 }
  0xeb   : > { %v586_v61 = vpop.xlane.xlu0 %585  ;;  %v610_v62 = vpop.xlane.xlu1 %609 }
  0xec   : > { %v598_v0 = vmul.f32 0.03125, %v586_v61  ;;  %v622_v1 = vmul.f32 0.03125, %v610_v62 }
  0xee   : > { %v634_v2 = vsub.f32 %v622_v1, %v628_v63  ;;  %v629_v6 = vmul.f32 %v598_v0, %v598_v0  ;;  %v647_v53 = vsub.f32 %v2529_v15, %v598_v0 }
  0xef   : > { %v588_v4 = vpop.xlane.xlu0 %587  ;;  %v612_v5 = vpop.xlane.xlu1 %611 }
  0xf0   : > { %v640_v7 = vmax.f32 %v634_v2, 0.0  ;;  %v599_v8 = vmul.f32 0.03125, %v588_v4  ;;  %v623_v9 = vmul.f32 0.03125, %v612_v5 }
  0xf2   : > { %v652_v10 = vadd.f32 1e-05, %v640_v7  ;;  %v635_v11 = vsub.f32 %v623_v9, %v629_v6  ;;  %v630_v16 = vmul.f32 %v599_v8, %v599_v8  ;;  %v648_v57 = vsub.f32 %v2534_v17, %v599_v8 }
  0xf3   : > { %v614_v18 = vpop.xlane.xlu0 %613  ;;  %v616_v19 = vpop.xlane.xlu1 %615 }
  0xf4   : > { %2118 = vrsqrt.f32 %v652_v10  ;;  %v641_v22 = vmax.f32 %v635_v11, 0.0  ;;  %v624_v23 = vmul.f32 0.03125, %v614_v18  ;;  %v625_v24 = vmul.f32 0.03125, %v616_v19  ;;  %v1367_v18 = vld [vmem:[#allocation5 + $0x58] sm:$0xff]  ;;  %v1366_v19 = vld [vmem:[#allocation5 + $0x50] sm:$0xff] }
  0xf6   : > { %v653_v25 = vadd.f32 1e-05, %v641_v22  ;;  %v636_v26 = vsub.f32 %v624_v23, %v630_v16  ;;  %v637_v27 = vsub.f32 %v625_v24, %v631_v14  ;;  %v1371_v14 = vld [vmem:[#allocation5 + $0x78] sm:$0xff]  ;;  %v1368_v16 = vld [vmem:[#allocation5 + $0x60] sm:$0xff]  ;;  %v1365_v22 = vld [vmem:[#allocation5 + $0x48] sm:$0xff] }
  0xf7   : > { %v592_v28 = vpop.xlane.xlu0 %591  ;;  %v596_v29 = vpop.xlane.xlu1 %595  ;;  %1951 = vmatprep.subr.mxu0 %v1371_v14  ;;  %v1364_v23 = vld [vmem:[#allocation5 + $0x40] sm:$0xff]  ;;  %v1363_v24 = vld [vmem:[#allocation5 + $0x38] sm:$0xff] }
  0xf8   : > { %2120 = vrsqrt.f32 %v653_v25  ;;  %v642_v30 = vmax.f32 %v636_v26, 0.0  ;;  %v643_v31 = vmax.f32 %v637_v27, 0.0  ;;  %v601_v32 = vmul.f32 0.03125, %v592_v28  ;;  %v1362_v25 = vld [vmem:[#allocation5 + $0x30] sm:$0xff]  ;;  %v1361_v26 = vld [vmem:[#allocation5 + $0x28] sm:$0xff]  ;;  %v1360_v27 = vld [vmem:[#allocation5 + $0x20] sm:$0xff] }
  0xf9   : > { %v602_v33 = vmul.f32 0.03125, %v596_v29  ;;  %v1359_v28 = vld [vmem:[#allocation5 + $0x18] sm:$0xff]  ;;  %v1358_v29 = vld [vmem:[#allocation5 + $0x10] sm:$0xff] }
  0xfa   : > { %v654_v34 = vadd.f32 1e-05, %v642_v30  ;;  %v655_v35 = vadd.f32 1e-05, %v643_v31  ;;  %v632_v39 = vmul.f32 %v601_v32, %v601_v32  ;;  %v650_v5 = vsub.f32 %v2543_v21, %v601_v32  ;;  %v1370_v21 = vld [vmem:[#allocation5 + $0x70] sm:$0xff]  ;;  %v1357_v30 = vld [vmem:[#allocation5 + $0x8] sm:$0xff] }
  0xfb   : > { %v633_v36 = vmul.f32 %v602_v33, %v602_v33  ;;  %v618_v37 = vpop.xlane.xlu0 %617  ;;  %v621_v38 = vpop.xlane.xlu1 %620  ;;  %v651_v6 = vsub.f32 %v2541_v20, %v602_v33  ;;  %v1369_v20 = vld [vmem:[#allocation5 + $0x68] sm:$0xff]  ;;  %v1356_v31 = vld [vmem:[#allocation5] sm:$0xff]  ;;  %v1471_v32 = vld [vmem:[#allocation8 + $0x78] sm:$0xff] }
  0xfc   : > { %2122 = vrsqrt.f32 %v654_v34  ;;  %v626_v40 = vmul.f32 0.03125, %v618_v37  ;;  %v627_v41 = vmul.f32 0.03125, %v621_v38  ;;  %v1470_v33 = vld [vmem:[#allocation8 + $0x70] sm:$0xff]  ;;  %1986 = vmatprep.subr.mxu1 %v1471_v32  ;;  %v1469_v34 = vld [vmem:[#allocation8 + $0x68] sm:$0xff] }
  0xfd   : > { %2124 = vrsqrt.f32 %v655_v35  ;;  %v1468_v35 = vld [vmem:[#allocation8 + $0x60] sm:$0xff]  ;;  %v1466_v37 = vld [vmem:[#allocation8 + $0x50] sm:$0xff]  ;;  %v1465_v38 = vld [vmem:[#allocation8 + $0x48] sm:$0xff] }
  0xfe   : > { %v638_v42 = vsub.f32 %v626_v40, %v632_v39  ;;  %v639_v43 = vsub.f32 %v627_v41, %v633_v36  ;;  %v1467_v36 = vld [vmem:[#allocation8 + $0x58] sm:$0xff]  ;;  %v1464_v39 = vld [vmem:[#allocation8 + $0x40] sm:$0xff]  ;;  %v1462_v41 = vld [vmem:[#allocation8 + $0x30] sm:$0xff] }
  0xff   : > { %v1463_v40 = vld [vmem:[#allocation8 + $0x38] sm:$0xff] }
 0x100   : > { %v644_v45 = vmax.f32 %v638_v42, 0.0  ;;  %v645_v46 = vmax.f32 %v639_v43, 0.0  ;;  %v1461_v42 = vld [vmem:[#allocation8 + $0x28] sm:$0xff]  ;;  %v1460_v43 = vld [vmem:[#allocation8 + $0x20] sm:$0xff] }
 0x101   : > { %v2119_v47 = vpop.eup %2118 }
 0x102   : > { %v656_v49 = vadd.f32 1e-05, %v644_v45  ;;  %v657_v50 = vadd.f32 1e-05, %v645_v46  ;;  %v664_v51 = vmul.f32 %v2119_v47, %v646_v44  ;;  %v1741_v44 = vld [vmem:[%s2892_s6] ss:$0 sm:$0xff] }
 0x104   : > { %2126 = vrsqrt.f32 %v656_v49  ;;  %v677_v54 = vmul.f32 %v1738_v48, %v664_v51 }
 0x105   : > { %v2121_v55 = vpop.eup %2120  ;;  %2128 = vrsqrt.f32 %v657_v50 }
 0x106   : > { %v690_v13 = vadd.f32 %v1739_v52, %v677_v54  ;;  %v665_v56 = vmul.f32 %v2121_v55, %v647_v53 }
 0x108   : > { %1901 = vmatprep.mubr.f32.mxu0 %v690_v13  ;;  %1942 = vmatprep.mubr.f32.mxu1 %v690_v13  ;;  %v678_v58 = vmul.f32 %v1738_v48, %v665_v56 }
 0x109   : > { %v2123_v59 = vpop.eup %2122 }
 0x10a   : > { %v2125_v61 = vpop.eup %2124  ;;  %v691_v62 = vadd.f32 %v1739_v52, %v678_v58  ;;  %v666_v63 = vmul.f32 %v2123_v59, %v648_v57  ;;  %v974_v58 = vlaneseq }
 0x10b   : > { %v667_v1 = vmul.f32 %v2125_v61, %v649_v60 }
 0x10c   : > { %1902 = vmatmul.mubr.f32.vlgmr.msra.gmra.mxu0 %v691_v62  ;;  %1943 = vmatmul.mubr.f32.vlgmr.msra.gmra.mxu1 %v691_v62  ;;  %v679_v15 = vmul.f32 %v1738_v48, %v666_v63 }
 0x10d   : > { %v680_v0 = vmul.f32 %v1738_v48, %v667_v1  ;;  %1952 = vmatpush3.msra.mxu0 %v1371_v14  ;;  %1987 = vmatpush3.msra.mxu1 %v1471_v32  ;;  %v2673_v14 = vld [vmem:[%s2890_s4] ss:$0 sm:$0xff] }
 0x10e   : > { %v692_v2 = vadd.f32 %v1739_v52, %v679_v15  ;;  %1953 = vmatprep.subr.mxu0 %v1370_v21  ;;  %1988 = vmatprep.subr.mxu1 %v1470_v33  ;;  %v975_v15 = vshrl.u32 %v974_v58, 7 }
 0x10f   : > { %v693_v4 = vadd.f32 %v1739_v52, %v680_v0  ;;  %1954 = vmatpush3.msra.mxu0 %v1370_v21  ;;  %1989 = vmatpush3.msra.mxu1 %v1470_v33 }
 0x110   : > { %1904 = vmatprep.mubr.f32.mxu0 %v692_v2  ;;  %1945 = vmatprep.mubr.f32.mxu1 %v692_v2  ;;  %v977_v21 = vadd.s32 16, %v975_v15 }
 0x111   : > { %v2127_v17 = vpop.eup %2126  ;;  %1905 = vmatmul.mubr.f32.gmra.mxu0 %v693_v4  ;;  %1946 = vmatmul.mubr.f32.gmra.mxu1 %v693_v4 }
 0x112   : > { %v2129_v12 = vpop.eup %2128  ;;  %v668_v3 = vmul.f32 %v2127_v17, %v650_v5  ;;  %1955 = vmatprep.subr.mxu0 %v1369_v20  ;;  %1990 = vmatprep.subr.mxu1 %v1469_v34  ;;  %v976_v5 = vadd.s32 8, %v975_v15  ;;  %v982_v17 = vstv %s1748_s15  ;;  %s2314_s15 = smov [#allocation10]  }
 0x113   : > { %v669_v7 = vmul.f32 %v2129_v12, %v651_v6  ;;  %1956 = vmatpush3.msra.mxu0 %v1369_v20  ;;  %1991 = vmatpush3.msra.mxu1 %v1469_v34  ;;  %s2210_s19 = sshll.u32 %s2314_s15, 4  ;;  %s2211_s19 = int_to_ptr.vmem [resolvable:$false] %s2210_s19 }
 0x114   : > { %v681_v8 = vmul.f32 %v1738_v48, %v668_v3  ;;  %1957 = vmatprep.subr.mxu0 %v1368_v16  ;;  %1992 = vmatprep.subr.mxu1 %v1468_v35  ;;  %s2212_s20 = scalar_lea.vmem %s2211_s19, 512  ;;  %p2213_p4 = scmp.lt.s32.totalorder %s2824_s30, %s2211_s19 }
 0x115   : > { %v682_v9 = vmul.f32 %v1738_v48, %v669_v7  ;;  %1958 = vmatpush3.msra.mxu0 %v1368_v16  ;;  %1993 = vmatpush3.msra.mxu1 %v1468_v35  ;;  %v979_v35 = vadd.s32 32, %v975_v15  ;;  %p2214_p5 = scmp.lt.s32.totalorder %s2212_s20, %s2206_s21 }
 0x116   : > { %v694_v10 = vadd.f32 %v1739_v52, %v681_v8  ;;  %1959 = vmatprep.subr.mxu0 %v1367_v18  ;;  %1994 = vmatprep.subr.mxu1 %v1467_v36  ;;  %v984_v8 = vadd.s32 %v982_v17, %v976_v5 }
 0x117   : > { %v695_v11 = vadd.f32 %v1739_v52, %v682_v9  ;;  %1960 = vmatpush3.msra.mxu0 %v1367_v18  ;;  %1995 = vmatpush3.msra.mxu1 %v1467_v36  ;;  %v978_v9 = vadd.s32 24, %v975_v15  ;;  %p2215_p6 = por %p2214_p5, %p2213_p4 }
 0x118   : > { %1907 = vmatprep.mubr.f32.mxu0 %v694_v10  ;;  %1948 = vmatprep.mubr.f32.mxu1 %v694_v10  ;;  %vm990_vm1 = vcmp.ge.s32.totalorder %v984_v8, 15  ;;  %vm996_vm2 = vcmp.lt.s32.totalorder %v984_v8, 63  ;;  %v1756_v8 = vld [vmem:[%s2893_s7 + $0x7] ss:$0 sm:$0xff] }
 0x119   : > { %1908 = vmatmul.mubr.f32.gmra.mxu0 %v695_v11  ;;  %1949 = vmatmul.mubr.f32.gmra.mxu1 %v695_v11  ;;  %v983_v11 = vadd.s32 %v982_v17, %v975_v15  ;;  %v986_v16 = vadd.s32 %v982_v17, %v978_v9  ;;  %vm1002_vm5 = vmand %vm990_vm1, %vm996_vm2  ;;  %p2216_p7 = pnand %p2215_p6, %p2209_p2 }
 0x11a   : > { %1961 = vmatprep.subr.mxu0 %v1366_v19  ;;  %1996 = vmatprep.subr.mxu1 %v1466_v37 }
 0x11b   : > { %1962 = vmatpush3.msra.mxu0 %v1366_v19  ;;  %1997 = vmatpush3.msra.mxu1 %v1466_v37  ;;  %vm989_vm3 = vcmp.ge.s32.totalorder %v983_v11, 15  ;;  %vm995_vm4 = vcmp.lt.s32.totalorder %v983_v11, 63  ;;  %vm992_vm7 = vcmp.ge.s32.totalorder %v986_v16, 15  ;;  %vm998_vm8 = vcmp.lt.s32.totalorder %v986_v16, 63  ;;  %v1759_v16 = vld [vmem:[%s2893_s7 + $0xa] ss:$0 sm:$0xff] }
 0x11c   : > { %1963 = vmatprep.subr.mxu0 %v1365_v22  ;;  %1998 = vmatprep.subr.mxu1 %v1465_v38  ;;  %vm1001_vm6 = vmand %vm989_vm3, %vm995_vm4 }
 0x11d   : > { %1964 = vmatpush3.msra.mxu0 %v1365_v22  ;;  %1999 = vmatpush3.msra.mxu1 %v1465_v38  ;;  %vm1004_vm11 = vmand %vm992_vm7, %vm998_vm8 }
 0x11e   : > { %1965 = vmatprep.subr.mxu0 %v1364_v23  ;;  %2000 = vmatprep.subr.mxu1 %v1464_v39 }
 0x11f   : > { %1966 = vmatpush3.msra.mxu0 %v1364_v23  ;;  %2001 = vmatpush3.msra.mxu1 %v1464_v39 }
 0x120   : > { %1967 = vmatprep.subr.mxu0 %v1363_v24  ;;  %2002 = vmatprep.subr.mxu1 %v1463_v40 }
 0x121   : > { %1968 = vmatpush3.msra.mxu0 %v1363_v24  ;;  %2003 = vmatpush3.msra.mxu1 %v1463_v40 }
 0x122   : > { %1969 = vmatprep.subr.mxu0 %v1362_v25  ;;  %2004 = vmatprep.subr.mxu1 %v1462_v41 }
 0x123   : > { %1970 = vmatpush3.msra.mxu0 %v1362_v25  ;;  %2005 = vmatpush3.msra.mxu1 %v1462_v41  ;;  %v985_v25 = vadd.s32 %v982_v17, %v977_v21 }
 0x124   : > { %1971 = vmatprep.subr.mxu0 %v1361_v26  ;;  %2006 = vmatprep.subr.mxu1 %v1461_v42 }
 0x125   : > { %1972 = vmatpush3.msra.mxu0 %v1361_v26  ;;  %2007 = vmatpush3.msra.mxu1 %v1461_v42  ;;  %vm991_vm9 = vcmp.ge.s32.totalorder %v985_v25, 15  ;;  %vm997_vm10 = vcmp.lt.s32.totalorder %v985_v25, 63 }
 0x126   : > { %1973 = vmatprep.subr.mxu0 %v1360_v27  ;;  %2008 = vmatprep.subr.mxu1 %v1460_v43  ;;  %vm1003_vm12 = vmand %vm991_vm9, %vm997_vm10 }
 0x127   : > { %1974 = vmatpush3.msra.mxu0 %v1360_v27  ;;  %2009 = vmatpush3.msra.mxu1 %v1460_v43 }
 0x128   : > { %1975 = vmatprep.subr.mxu0 %v1359_v28 }
 0x129   : > { %1976 = vmatpush3.msra.mxu0 %v1359_v28 }
 0x12a   : > { %1977 = vmatprep.subr.mxu0 %v1358_v29 }
 0x12b   : > { %1978 = vmatpush3.msra.mxu0 %v1358_v29 }
 0x12c   : > { %1979 = vmatprep.subr.mxu0 %v1357_v30 }
 0x12d   : > { %1980 = vmatpush3.msra.mxu0 %v1357_v30  ;;  %v980_v30 = vadd.s32 40, %v975_v15 }
 0x12e   : > { %1981 = vmatprep.subr.mxu0 %v1356_v31 }
 0x12f   : > { %1982 = vmatpush3.msra.mxu0 %v1356_v31  ;;  %v988_v40 = vadd.s32 %v982_v17, %v980_v30 }
 0x131   : > { %vm994_vm13 = vcmp.ge.s32.totalorder %v988_v40, 15  ;;  %vm1000_vm14 = vcmp.lt.s32.totalorder %v988_v40, 63 }
 0x132   : > { %vm2695_vm1 = vmand %vm994_vm13, %vm1000_vm14 }
 0x1cc   : > { %v1944_v45 = vpop.f32.mrf.mxu1  ;;  %v1903_v3 = vpop.f32.mrf.mxu0 }
 0x1cd   : > { %v909_v46 = vadd.f32 %v1944_v45, %v1741_v44  ;;  %v791_v22 = vadd.f32 %v1903_v3, %v2673_v14  ;;  %v987_v45 = vadd.s32 %v982_v17, %v979_v35 }
 0x1ce   : > { %v903_v47 = vpop.f32.mrf.mxu1  ;;  %v785_v10 = vpop.f32.mrf.mxu0 }
 0x1cf   : > { %v1743_v48 = vmul.f32 -1.442695, %v909_v46  ;;  %v904_v49 = vadd.f32 %v1741_v44, %v903_v47  ;;  %v786_v28 = vadd.f32 %v2673_v14, %v785_v10  ;;  %vm993_vm15 = vcmp.ge.s32.totalorder %v987_v45, 15 }
 0x1d0   : > { %vm999_vm0 = vcmp.lt.s32.totalorder %v987_v45, 63 }
 0x1d1   : > { %2130 = vpow2.f32 %v1743_v48  ;;  %v1742_v50 = vmul.f32 -1.442695, %v904_v49  ;;  %v1947_v51 = vpop.f32.mrf.mxu1  ;;  %v1906_v23 = vpop.f32.mrf.mxu0  ;;  %v1749_v48 = vld [vmem:[%s2893_s7] ss:$0 sm:$0xff]  ;;  %v1757_v49 = vld [vmem:[%s2893_s7 + $0x8] ss:$0 sm:$0xff]  ;;  %vm2714_vm2 = vmand %vm993_vm15, %vm999_vm0 }
 0x1d2   : > { %v919_v52 = vadd.f32 %v1947_v51, %v1741_v44  ;;  %v801_v34 = vadd.f32 %v1906_v23, %v2673_v14  ;;  %v1750_v51 = vld [vmem:[%s2893_s7 + $0x1] ss:$0 sm:$0xff] }
 0x1d3   : > { %2132 = vpow2.f32 %v1742_v50  ;;  %v913_v53 = vpop.f32.mrf.mxu1  ;;  %v795_v33 = vpop.f32.mrf.mxu0 }
 0x1d4   : > { %v1745_v54 = vmul.f32 -1.442695, %v919_v52  ;;  %v914_v55 = vadd.f32 %v1741_v44, %v913_v53  ;;  %v796_v39 = vadd.f32 %v2673_v14, %v795_v33  ;;  %v1753_v52 = vld [vmem:[%s2893_s7 + $0x4] ss:$0 sm:$0xff] }
 0x1d6   : > { %2134 = vpow2.f32 %v1745_v54  ;;  %v1744_v13 = vmul.f32 -1.442695, %v914_v55  ;;  %v1751_v55 = vld [vmem:[%s2893_s7 + $0x2] ss:$0 sm:$0xff]  ;;  %v1762_v54 = vld [vmem:[%s2893_s7 + $0xd] ss:$0 sm:$0xff] }
 0x1d8   : > { %2136 = vpow2.f32 %v1744_v13  ;;  %v1752_v13 = vld [vmem:[%s2893_s7 + $0x3] ss:$0 sm:$0xff] }
 0x1d9   : > { %v1950_v56 = vpop.f32.mrf.mxu1  ;;  %v1909_v42 = vpop.f32.mrf.mxu0 }
 0x1da   : > { %v929_v57 = vadd.f32 %v1950_v56, %v1741_v44  ;;  %v811_v50 = vadd.f32 %v1909_v42, %v2673_v14  ;;  %v1754_v56 = vld [vmem:[%s2893_s7 + $0x5] ss:$0 sm:$0xff] }
 0x1db   : > { %v923_v59 = vpop.f32.mrf.mxu1  ;;  %v805_v47 = vpop.f32.mrf.mxu0 }
 0x1dc   : > { %v1747_v60 = vmul.f32 -1.442695, %v929_v57  ;;  %v924_v61 = vadd.f32 %v1741_v44, %v923_v59  ;;  %v1765_v57 = vld [vmem:[%s2893_s7 + $0x10] ss:$0 sm:$0xff]  ;;  %v806_v59 = vadd.f32 %v2673_v14, %v805_v47  ;;  %v1760_v47 = vld [vmem:[%s2893_s7 + $0xb] ss:$0 sm:$0xff] }
 0x1de   : > { %v2131_v62 = vpop.eup %2130  ;;  %2138 = vpow2.f32 %v1747_v60  ;;  %v1746_v63 = vmul.f32 -1.442695, %v924_v61 }
 0x1df   : > { %v951_v1 = vadd.f32 1.0, %v2131_v62 }
 0x1e0   : > { %v2133_v0 = vpop.eup %2132  ;;  %2140 = vpow2.f32 %v1746_v63 }
 0x1e1   : > { %2142 = vrcp.f32 %v951_v1  ;;  %v950_v2 = vadd.f32 1.0, %v2133_v0  ;;  %v1763_v1 = vld [vmem:[%s2893_s7 + $0xe] ss:$0 sm:$0xff] }
 0x1e3   : > { %v2135_v4 = vpop.eup %2134  ;;  %2144 = vrcp.f32 %v950_v2 }
 0x1e4   : > { %v953_v6 = vadd.f32 1.0, %v2135_v4 }
 0x1e5   : > { %v2137_v12 = vpop.eup %2136 }
 0x1e6   : > { %2146 = vrcp.f32 %v953_v6  ;;  %v952_v7 = vadd.f32 1.0, %v2137_v12 }
 0x1e8   : > { %2148 = vrcp.f32 %v952_v7  ;;  %v1755_v7 = vld [vmem:[%s2893_s7 + $0x6] ss:$0 sm:$0xff] }
 0x1eb   : > { %v2139_v20 = vpop.eup %2138 }
 0x1ec   : > { %v955_v18 = vadd.f32 1.0, %v2139_v20  ;;  %v1758_v20 = vld [vmem:[%s2893_s7 + $0x9] ss:$0 sm:$0xff] }
 0x1ed   : > { %v2141_v19 = vpop.eup %2140 }
 0x1ee   : > { %v2143_v24 = vpop.eup %2142  ;;  %2150 = vrcp.f32 %v955_v18  ;;  %v954_v26 = vadd.f32 1.0, %v2141_v19 }
 0x1ef   : > { %v969_v27 = vmul.f32 %v2143_v24, %v791_v22 }
 0x1f0   : > { %v2145_v29 = vpop.eup %2144  ;;  %2152 = vrcp.f32 %v954_v26 }
 0x1f1   : > { %v1020_v31 = vsel %vm1002_vm5, %v969_v27, 0.0  ;;  %v968_v32 = vmul.f32 %v2145_v29, %v786_v28 }
 0x1f2   : > { %1026 = vst [vmem:[#allocation3 + $0x8] sm:$0xff] %v1020_v31  ;;  %v1039_v15 = vmul.f32 %v1749_v48, %v1020_v31  ;;  %v1125_v5 = vmul.f32 %v1757_v49, %v1020_v31 }
 0x1f3   : > { %v2147_v36 = vpop.eup %2146  ;;  %v1019_v37 = vsel %vm1001_vm6, %v968_v32, 0.0 }
 0x1f4   : > { %1025 = vst [vmem:[#allocation3] sm:$0xff] %v1019_v37  ;;  %v971_v38 = vmul.f32 %v2147_v36, %v801_v34  ;;  %v1038_v12 = vmul.f32 %v1749_v48, %v1019_v37  ;;  %v1761_v48 = vld [vmem:[%s2893_s7 + $0xc] ss:$0 sm:$0xff] }
 0x1f5   : > { %v2149_v41 = vpop.eup %2148 }
 0x1f6   : > { %v2679_v43 = vsel %vm1004_vm11, %v971_v38, 0.0  ;;  %v970_v44 = vmul.f32 %v2149_v41, %v796_v39 }
 0x1f7   : > { %1028 = vst [vmem:[#allocation3 + $0x18] sm:$0xff] %v2679_v43  ;;  %v2727_v9 = vmul.f32 %v1765_v57, %v2679_v43 }
 0x1f8   : > { %v1021_v46 = vsel %vm1003_vm12, %v970_v44, 0.0 }
 0x1f9   : > { %1027 = vst [vmem:[#allocation3 + $0x10] sm:$0xff] %v1021_v46  ;;  %v1126_v21 = vmul.f32 %v1757_v49, %v1021_v46  ;;  %v2735_v18 = vmul.f32 %v1765_v57, %v1021_v46 }
 0x1fb   : > { %v2151_v53 = vpop.eup %2150  ;;  %v1042_v60 = vld [vmem:[#allocation3 + $0x1] sm:$0xff] }
 0x1fc   : > { %v973_v58 = vmul.f32 %v2151_v53, %v811_v50  ;;  %v1075_v61 = vld [vmem:[#allocation3 + $0x4] sm:$0xff]  ;;  %v1049_v10 = vmul.f32 %v1750_v51, %v1042_v60 }
 0x1fd   : > { %v1086_v62 = vld [vmem:[#allocation3 + $0x5] sm:$0xff]  ;;  %v2153_v63 = vpop.eup %2152  ;;  %v1082_v4 = vmul.f32 %v1753_v52, %v1075_v61 }
 0x1fe   : > { %v1053_v0 = vld [vmem:[#allocation3 + $0x2] sm:$0xff]  ;;  %v1024_v17 = vsel %vm2695_vm1, %v973_v58, 0.0  ;;  %v972_v6 = vmul.f32 %v2153_v63, %v806_v59  ;;  %v1093_v11 = vmul.f32 %v1754_v56, %v1086_v62 }
 0x1ff   : > { %v1064_v2 = vld [vmem:[#allocation3 + $0x3] sm:$0xff]  ;;  %1030 = vst [vmem:[#allocation3 + $0x28] sm:$0x3f] %v1024_v17  ;;  %v1060_v24 = vmul.f32 %v1751_v55, %v1053_v0  ;;  %v1084_v27 = vadd.f32 %v1082_v4, %v1038_v12  ;;  %v1764_v17 = vld [vmem:[%s2893_s7 + $0xf] ss:$0 sm:$0xff] }
 0x200   : > { %v1097_v3 = vld [vmem:[#allocation3 + $0x6] sm:$0xff]  ;;  %v2739_v19 = vsel %vm2714_vm2, %v972_v6, 0.0  ;;  %v1071_v26 = vmul.f32 %v1752_v13, %v1064_v2  ;;  %v1098_v33 = vld [vmem:[#allocation3 + $0xe] sm:$0xff]  ;;  %v1095_v42 = vadd.f32 %v1093_v11, %v1049_v10 }
 0x201   : > { %v1108_v14 = vld [vmem:[#allocation3 + $0x7] sm:$0xff]  ;;  %1029 = vst [vmem:[#allocation3 + $0x20] sm:$0xff] %v2739_v19  ;;  %v1104_v34 = vmul.f32 %v1755_v7, %v1097_v3  ;;  %v1105_v37 = vmul.f32 %v1755_v7, %v1098_v33  ;;  %v1109_v38 = vld [vmem:[#allocation3 + $0xf] sm:$0xff] }
 0x202   : > { %v1043_v22 = vld [vmem:[#allocation3 + $0x9] sm:$0xff]  ;;  %v1129_v39 = vld [vmem:[#allocation3 + $0x11] sm:$0xff]  ;;  %v1115_v44 = vmul.f32 %v1756_v8, %v1108_v14  ;;  %v1116_v45 = vmul.f32 %v1756_v8, %v1109_v38 }
 0x203   : > { %v1054_v23 = vld [vmem:[#allocation3 + $0xa] sm:$0xff]  ;;  %v1050_v28 = vmul.f32 %v1750_v51, %v1043_v22  ;;  %v1135_v40 = vmul.f32 %v1758_v20, %v1043_v22  ;;  %v1139_v41 = vld [vmem:[#allocation3 + $0x12] sm:$0xff] }
 0x204   : > { %v1065_v25 = vld [vmem:[#allocation3 + $0xb] sm:$0xff]  ;;  %v1061_v29 = vmul.f32 %v1751_v55, %v1054_v23  ;;  %v1145_v46 = vmul.f32 %v1759_v16, %v1054_v23  ;;  %v1159_v53 = vld [vmem:[#allocation3 + $0x14] sm:$0xff]  ;;  %v1106_v55 = vadd.f32 %v1104_v34, %v1060_v24  ;;  %v1146_v57 = vmul.f32 %v1759_v16, %v1139_v41 }
 0x205   : > { %v1072_v30 = vmul.f32 %v1752_v13, %v1065_v25  ;;  %v1076_v31 = vld [vmem:[#allocation3 + $0xc] sm:$0xff]  ;;  %v1136_v13 = vmul.f32 %v1758_v20, %v1129_v39  ;;  %v1155_v61 = vmul.f32 %v1760_v47, %v1065_v25  ;;  %v1169_v63 = vld [vmem:[#allocation3 + $0x15] sm:$0xff]  ;;  %v1166_v2 = vmul.f32 %v1761_v48, %v1159_v53 }
 0x206   : > { %v1087_v32 = vld [vmem:[#allocation3 + $0xd] sm:$0xff]  ;;  %v1083_v35 = vmul.f32 %v1753_v52, %v1076_v31  ;;  %v1107_v51 = vadd.f32 %v1105_v37, %v1061_v29  ;;  %v1127_v52 = vadd.f32 %v1125_v5, %v1084_v27  ;;  %v1165_v62 = vmul.f32 %v1761_v48, %v1076_v31  ;;  %v1179_v5 = vld [vmem:[#allocation3 + $0x16] sm:$0xff] }
 0x207   : > { %v1094_v36 = vmul.f32 %v1754_v56, %v1087_v32  ;;  %v1137_v56 = vadd.f32 %v1135_v40, %v1095_v42  ;;  %v1149_v58 = vld [vmem:[#allocation3 + $0x13] sm:$0xff]  ;;  %v1118_v59 = vadd.f32 %v1116_v45, %v1072_v30  ;;  %v1147_v0 = vadd.f32 %v1145_v46, %v1106_v55  ;;  %v1766_v10 = vld [vmem:[%s2893_s7 + $0x11] ss:$0 sm:$0xff] }
 0x208   : > { %v1085_v49 = vadd.f32 %v1083_v35, %v1039_v15  ;;  %v1175_v4 = vmul.f32 %v1762_v54, %v1087_v32  ;;  %v1117_v6 = vadd.f32 %v1115_v44, %v1071_v26  ;;  %v1148_v12 = vadd.f32 %v1146_v57, %v1107_v51  ;;  %v2757_v8 = vld [vmem:[#allocation3 + $0x17] sm:$0xff]  ;;  %v1767_v26 = vld [vmem:[%s2893_s7 + $0x12] ss:$0 sm:$0xff]  ;;  %v1770_v40 = vld [vmem:[%s2893_s7 + $0x15] ss:$0 sm:$0xff] }
 0x209   : > { %v1096_v50 = vadd.f32 %v1094_v36, %v1050_v28  ;;  %v1156_v3 = vmul.f32 %v1760_v47, %v1149_v58  ;;  %v1167_v7 = vadd.f32 %v1165_v62, %v1127_v52  ;;  %v1176_v14 = vmul.f32 %v1762_v54, %v1169_v63  ;;  %v1209_v16 = vld [vmem:[#allocation3 + $0x19] sm:$0xff]  ;;  %v1771_v51 = vld [vmem:[%s2893_s7 + $0x16] ss:$0 sm:$0xff] }
 0x20a   : > { %v1128_v60 = vadd.f32 %v1126_v21, %v1085_v49  ;;  %v1177_v21 = vadd.f32 %v1175_v4, %v1137_v56  ;;  %v1185_v20 = vmul.f32 %v1763_v1, %v1098_v33  ;;  %v1219_v22 = vld [vmem:[#allocation3 + $0x1a] sm:$0xff]  ;;  %v1157_v23 = vadd.f32 %v1155_v61, %v1117_v6  ;;  %v1769_v33 = vld [vmem:[%s2893_s7 + $0x14] ss:$0 sm:$0xff] }
 0x20b   : > { %v1138_v15 = vadd.f32 %v1136_v13, %v1096_v50  ;;  %v1158_v24 = vadd.f32 %v1156_v3, %v1118_v59  ;;  %v1186_v25 = vmul.f32 %v1763_v1, %v1179_v5  ;;  %v1195_v27 = vmul.f32 %v1764_v17, %v1109_v38  ;;  %v2765_v28 = vld [vmem:[#allocation3 + $0x1c] sm:$0xff] }
 0x20c   : > { %v1168_v11 = vadd.f32 %v1166_v2, %v1128_v60  ;;  %v1187_v30 = vadd.f32 %v1185_v20, %v1147_v0  ;;  %v1196_v31 = vmul.f32 %v1764_v17, %v2757_v8  ;;  %v1215_v32 = vmul.f32 %v1766_v10, %v1129_v39  ;;  %v2768_v34 = vld [vmem:[#allocation3 + $0x1b] sm:$0xff]  ;;  %v1768_v39 = vld [vmem:[%s2893_s7 + $0x13] ss:$0 sm:$0xff]  ;;  %v1772_v0 = vld [vmem:[%s2893_s7 + $0x17] ss:$0 sm:$0xff] }
 0x20d   : > { %v1178_v29 = vadd.f32 %v1176_v14, %v1138_v15  ;;  %v1207_v35 = vadd.f32 %v2735_v18, %v1167_v7  ;;  %v1216_v37 = vmul.f32 %v1766_v10, %v1209_v16  ;;  %v1226_v38 = vmul.f32 %v1767_v26, %v1219_v22  ;;  %v1249_v47 = vld [vmem:[#allocation3 + $0x1d] sm:$0xff] }
 0x20e   : > { %v1208_v36 = vadd.f32 %v2727_v9, %v1168_v11  ;;  %v1188_v42 = vadd.f32 %v1186_v25, %v1148_v12  ;;  %v1217_v44 = vadd.f32 %v1215_v32, %v1177_v21  ;;  %v1225_v45 = vmul.f32 %v1767_v26, %v1139_v41  ;;  %v1259_v50 = vld [vmem:[#allocation3 + $0x1e] sm:$0xff]  ;;  %v1773_v41 = vld [vmem:[%s2893_s7 + $0x18] ss:$0 sm:$0xff] }
 0x20f   : > { %v1246_v46 = vmul.f32 %v1769_v33, %v2765_v28  ;;  %v1197_v48 = vadd.f32 %v1195_v27, %v1157_v23  ;;  %v1218_v18 = vadd.f32 %v1216_v37, %v1178_v29  ;;  %v1236_v9 = vmul.f32 %v1768_v39, %v2768_v34  ;;  %v1289_v61 = vld [vmem:[#allocation3 + $0x21] sm:$0xff] }
 0x210   : > { %v1245_v49 = vmul.f32 %v1769_v33, %v1159_v53  ;;  %v1198_v52 = vadd.f32 %v1196_v31, %v1158_v24  ;;  %v1227_v54 = vadd.f32 %v1225_v45, %v1187_v30  ;;  %v1228_v55 = vadd.f32 %v1226_v38, %v1188_v42  ;;  %v1774_v53 = vld [vmem:[%s2893_s7 + $0x19] ss:$0 sm:$0xff]  ;;  %v1299_v12 = vld [vmem:[#allocation3 + $0x22] sm:$0xff]  ;;  %v1776_v30 = vld [vmem:[%s2893_s7 + $0x1b] ss:$0 sm:$0xff] }
 0x211   : > { %v1255_v13 = vmul.f32 %v1770_v40, %v1169_v63  ;;  %v1235_v56 = vmul.f32 %v1768_v39, %v1149_v58  ;;  %v1248_v59 = vadd.f32 %v1246_v46, %v1208_v36  ;;  %v1256_v60 = vmul.f32 %v1770_v40, %v1249_v47  ;;  %v1775_v58 = vld [vmem:[%s2893_s7 + $0x1a] ss:$0 sm:$0xff]  ;;  %v1269_v10 = vld [vmem:[#allocation3 + $0x1f] sm:$0xff] }
 0x212   : > { %v1247_v57 = vadd.f32 %v1245_v49, %v1207_v35  ;;  %v1265_v1 = vmul.f32 %v1771_v51, %v1179_v5  ;;  %v1266_v15 = vmul.f32 %v1771_v51, %v1259_v50  ;;  %v1285_v2 = vmul.f32 %v1773_v41, %v2679_v43  ;;  %v1777_v5 = vld [vmem:[%s2893_s7 + $0x1c] ss:$0 sm:$0xff]  ;;  %v1319_v43 = vld [vmem:[#allocation3 + $0x24] sm:$0xff] }
 0x213   : > { %v1257_v62 = vadd.f32 %v1255_v13, %v1217_v44  ;;  %v1237_v63 = vadd.f32 %v1235_v56, %v1197_v48  ;;  %v1238_v4 = vadd.f32 %v1236_v9, %v1198_v52  ;;  %v1258_v17 = vadd.f32 %v1256_v60, %v1218_v18  ;;  %v1329_v25 = vld [vmem:[#allocation3 + $0x25] sm:$0xff]  ;;  %v1457_v60 = vld [vmem:[#allocation8 + $0x8] sm:$0xff] }
 0x214   : > { %v1286_v6 = vmul.f32 %v1773_v41, %v2739_v19  ;;  %v1267_v3 = vadd.f32 %v1265_v1, %v1227_v54  ;;  %v1268_v7 = vadd.f32 %v1266_v15, %v1228_v55  ;;  %v1295_v11 = vmul.f32 %v1774_v53, %v1209_v16  ;;  %v1778_v19 = vld [vmem:[%s2893_s7 + $0x1d] ss:$0 sm:$0xff]  ;;  %v1340_v33 = vld [vmem:[#allocation3 + $0x26] sm:$0xff] }
 0x215   : > { %v1296_v14 = vmul.f32 %v1774_v53, %v1289_v61  ;;  %v1275_v21 = vmul.f32 %v1772_v0, %v2757_v8  ;;  %v1287_v20 = vadd.f32 %v1285_v2, %v1247_v57  ;;  %v1305_v24 = vmul.f32 %v1775_v58, %v1219_v22  ;;  %v1779_v22 = vld [vmem:[%s2893_s7 + $0x1e] ss:$0 sm:$0xff]  ;;  %v1309_v37 = vld [vmem:[#allocation3 + $0x23] sm:$0xff]  ;;  %v1780_v61 = vld [vmem:[%s2895_s9] ss:$0 sm:$0xff] }
 0x216   : > { %v1288_v23 = vadd.f32 %v1286_v6, %v1248_v59  ;;  %v1297_v27 = vadd.f32 %v1295_v11, %v1257_v62  ;;  %v1306_v29 = vmul.f32 %v1775_v58, %v1299_v12  ;;  %v1325_v16 = vmul.f32 %v1777_v5, %v2765_v28  ;;  %v1458_v59 = vld [vmem:[#allocation8 + $0x10] sm:$0xff] }
 0x217   : > { %v1298_v26 = vadd.f32 %v1296_v14, %v1258_v17  ;;  %v1276_v31 = vmul.f32 %v1772_v0, %v1269_v10  ;;  %v1277_v32 = vadd.f32 %v1275_v21, %v1237_v63  ;;  %v1326_v8 = vmul.f32 %v1777_v5, %v1319_v43  ;;  %v1781_v58 = vld [vmem:[%s2897_s11] ss:$0 sm:$0xff] }
 0x218   : > { %v1307_v35 = vadd.f32 %v1305_v24, %v1267_v3  ;;  %v1308_v36 = vadd.f32 %v1306_v29, %v1268_v7  ;;  %v1335_v38 = vmul.f32 %v1778_v19, %v1249_v47  ;;  %v1336_v40 = vmul.f32 %v1778_v19, %v1329_v25 }
 0x219   : > { %v1278_v42 = vadd.f32 %v1276_v31, %v1238_v4  ;;  %v1315_v44 = vmul.f32 %v1776_v30, %v2768_v34  ;;  %v1327_v45 = vadd.f32 %v1325_v16, %v1287_v20  ;;  %v1328_v39 = vadd.f32 %v1326_v8, %v1288_v23  ;;  %v1459_v34 = vld [vmem:[#allocation8 + $0x18] sm:$0xff] }
 0x21a   : > { %v1337_v46 = vadd.f32 %v1335_v38, %v1297_v27  ;;  %v1338_v28 = vadd.f32 %v1336_v40, %v1298_v26  ;;  %v1346_v48 = vmul.f32 %v1779_v22, %v1259_v50  ;;  %v1347_v18 = vmul.f32 %v1779_v22, %v1340_v33  ;;  %2010 = vmatprep.subr.mxu1 %v1459_v34  ;;  %v1456_v50 = vld [vmem:[#allocation8] sm:$0xff] }
 0x21b   : > { %v1316_v9 = vmul.f32 %v1776_v30, %v1309_v37  ;;  %v1317_v54 = vadd.f32 %v1315_v44, %v1277_v32  ;;  %2011 = vmatpush3.msra.mxu1 %v1459_v34 }
 0x21c   : > { %v1348_v49 = vadd.f32 %v1346_v48, %v1307_v35  ;;  %v1349_v51 = vadd.f32 %v1347_v18, %v1308_v36  ;;  %v1350_v41 = vadd.f32 %v1337_v46, %v1327_v45  ;;  %v1351_v52 = vadd.f32 %v1338_v28, %v1328_v39  ;;  %2012 = vmatprep.subr.mxu1 %v1458_v59 }
 0x21d   : > { %v1318_v55 = vadd.f32 %v1316_v9, %v1278_v42  ;;  %2013 = vmatpush3.msra.mxu1 %v1458_v59 }
 0x21e   : > { %v1352_v13 = vadd.f32 %v1350_v41, %v1348_v49  ;;  %v1353_v56 = vadd.f32 %v1351_v52, %v1349_v51  ;;  %2014 = vmatprep.subr.mxu1 %v1457_v60 }
 0x21f   : > { %2015 = vmatpush3.msra.mxu1 %v1457_v60 }
 0x220   : > { %v1354_v47 = vadd.f32 %v1352_v13, %v1317_v54  ;;  %v1355_v57 = vadd.f32 %v1353_v56, %v1318_v55  ;;  %2016 = vmatprep.subr.mxu1 %v1456_v50 }
 0x221   : > { %2017 = vmatpush3.msra.mxu1 %v1456_v50 }
 0x222   : > { %1983 = vmatprep.mubr.f32.mxu0 %v1354_v47 }
 0x223   : > { %1984 = vmatmul.mubr.f32.vlgmr.msra.gmra.mxu0 %v1355_v57 }
 0x2e3   : > { %v1985_v53 = vpop.f32.mrf.mxu0 }
 0x2e4   : > { %v1451_v62 = vadd.f32 %v1985_v53, %v1780_v61 }
 0x2e5   : > { %v1445_v1 = vpop.f32.mrf.mxu0 }
 0x2e6   : > { %v1446_v15 = vadd.f32 %v1780_v61, %v1445_v1  ;;  %v1455_v2 = vmax.f32 %v1451_v62, 0.0 }
 0x2e8   : > { %v1454_v0 = vmax.f32 %v1446_v15, 0.0 }
 0x2ea   : > { %2018 = vmatprep.mubr.f32.mxu1 %v1454_v0 }
 0x2eb   : > { %2019 = vmatmul.mubr.f32.vlgmr.msra.gmra.mxu1 %v1455_v2 }
 0x3ab   : > { %v2020_v63 = vpop.f32.mrf.mxu1 }
 0x3ac   : > { %v1551_v4 = vadd.f32 %v2020_v63, %v1781_v58 }
 0x3ad   : > { %v1545_v17 = vpop.f32.mrf.mxu1 }
 0x3ae   : > { %1555 = vst [vmem:[%s2505_s26 + $0x8] sm:$0xff] %v1551_v4  ;;  %v1546_v6 = vadd.f32 %v1781_v58, %v1545_v17 }
 0x3b0   : > { %1554 = vst [vmem:[%s2505_s26] sm:$0xff] %v1546_v6 }
 0x3b1   : > { %2219 = shalt.err (!%p2216_p7)
}
 0x3b2   : > { %s2220_s23 = scalar_lea.hbm %s2830_s27, 256  ;;  %s2224_s13 = scalar_lea.hbm %s2898_s12, 1536 }
 0x3b3   : > { %p2221_p9 = scmp.ne.s32.totalorder %s2830_s27, %s2220_s23  ;;  %p2225_p12 = scmp.lt.s32.totalorder %s2830_s27, %s2898_s12 }
 0x3b4   : > { %p2226_p1 = scmp.lt.s32.totalorder %s2224_s13, %s2220_s23 }
 0x3b5   : > { %p2222_p0 = pnand %p2221_p9, %p2434_p3 }
 0x3b6   : > { %p2227_p11 = por %p2226_p1, %p2225_p12 }
 0x3b7   : > { %p2223_p10 = pneg %p2222_p0 }
 0x3b9   : > { %p2228_p13 = pnand %p2227_p11, %p2223_p10 }
 0x3bb   : > { %2231 = shalt.err (!%p2228_p13)
}
 0x3bc   : > { %s2315_s25 = smov 128   ;;  %s2316_s24 = smov 8  }
 0x3bd   : > { %2030 = dma.vmem_to_hbm [thread:$0]  (%p2434_p3), %s2824_s30, 256, %s2830_s27, %s2835_s18, %s2315_s25, %s2315_s25, %s2316_s24  }
 0x3be PF: > { %s2923_s21 = sld [smem:[#allocation17_spill]]  ;;  %p2047_p2 = scmp.ge.s32.totalorder %s2308_s28, 2 }
 0x3c0   : > { %p2040_p4 = pnand %p2047_p2, %p2443_p8 }
 0x3c2   : > { %p2041_p5 = pneg %p2040_p4 }
 0x3c4   : > { %s1587_s19 = sand.u32 1, %s2923_s21  }
 0x3c5   : > { %s1588_s20 = scalar_lea.sflag [#allocation7], %s1587_s19 }
 0x3c6   : > { %2275 = dma.done.wait (%p2041_p5), %s1588_s20, 256  }
 0x3c7   : > { %2277 = vsyncadd (%p2041_p5), %s1588_s20, 4294967040  ;;  %s27_s28 = sadd.s32 1, %s2308_s28   ;;  %s2925_s23 = sld [smem:[#allocation18_spill]] }
 0x3c8   : > { %p24_p6 = scmp.ge.s32.totalorder %s27_s28, 8   ;;  %s2926_s26 = sld [smem:[#allocation24_spill]] }
 0x3c9   : > { %s2927_s24 = sld [smem:[#allocation19_spill]]  ;;  %s2931_s21 = smov %s2284_s22 }
 0x3ca   : > { %s2928_s25 = sld [smem:[#allocation20_spill]] }
 0x3cb   : > { %s2929_s17 = sld [smem:[#allocation21_spill]] }
 0x3cc   : > { %s2930_s27 = sld [smem:[#allocation22_spill]] }
 0x3cd   : > { %s2932_s22 = smov %s2925_s23  ;;  %26 = sbr.rel (!%p24_p6) target bundleno = 7 (0x7), region = 222 }
 0x3ce   : > { %s2933_s23 = smov %s2926_s26 }
 0x3d1   : > { %s2934_s26 = smov %s2929_s17 }
 0x3d2   :  { %1593 = vsyncpa [#allocation6], 1 }
 0x3d3   :  { %1595 = vsyncpa [#allocation6 + $0x1], 1 }
 0x3d4   :  { %1596 = vsyncpa [#allocation9], 1 }
 0x3d5   :  { %1597 = vsyncpa [#allocation7], 1 }
 0x3d6   :  { %1599 = vsyncpa [#allocation7 + $0x1], 1 }
 0x3d7   :  { %1600 = vsyncmov [#allocation4] }
 0x3da   :  { %s1601_s30 = vpop.sfrf %1600 }
 0x3db   :  { %p1787_p3 = scmp.ne.s32.totalorder %s1601_s30, 0 }
 0x3dd   :  { %1605 = shalt.err (%p1787_p3)  }
 0x3de   :  { %1607 = vsyncmov [#allocation4 + $0x1] }
 0x3e1   :  { %s1608_s18 = vpop.sfrf %1607 }
 0x3e2   :  { %p1788_p8 = scmp.ne.s32.totalorder %s1608_s18, 0 }
 0x3e4   :  { %1612 = shalt.err (%p1788_p8)  }

</bundles_post_ra>
